<compile_context>
chip_gen: v7x
topology: tpu7x:2x2x1
jax: 0.10.0
libtpu: 0.0.40
codegen_flags: <defaults>
</compile_context>

<pallas_src>
import functools

import jax
import jax.numpy as jnp
from jax.experimental import pallas as pl
from jax.experimental.pallas import tpu as pltpu


def make_lstm_kernel(num_layers, hidden, batch_pad, seq_len):
    H, B, T = hidden, batch_pad, seq_len

    def cell(gates, h_prev, c_prev, valid_bh):
        # g-gate columns were pre-scaled by 2 in the wrapper, so one sigmoid pass
        # suffices: tanh(g) = 2*sigmoid(2g) - 1 (cheap VPU fixup, no second EUP pass).
        sig = jax.nn.sigmoid(gates)              # (B, 4H)
        i_g = sig[:, 0 * H:1 * H]
        f_g = sig[:, 1 * H:2 * H]
        g_g = 2.0 * sig[:, 2 * H:3 * H] - 1.0    # == tanh of the original g pre-act
        o_g = sig[:, 3 * H:4 * H]
        c_new = f_g * c_prev + i_g * g_g
        h_new = o_g * jnp.tanh(c_new)
        # Freeze state past each sequence's length (packed-sequence behavior).
        c_new = jnp.where(valid_bh, c_new, c_prev)
        h_new = jnp.where(valid_bh, h_new, h_prev)
        return h_new, c_new

    def kernel(*refs):
        len_ref = refs[0]                        # (B, 1)   int32 (padded batch)
        x_ref = refs[1]                          # (T*B, D_in)
        wih0 = refs[2][...]                      # (D_in, 4H)  (g cols pre-scaled x2)
        b0 = refs[3][...]                        # (1, 4H)
        whh0 = refs[4][...]                      # (H, 4H)
        idx = 5
        wih, whh, bias = [], [], []
        for _ in range(num_layers - 1):
            wih.append(refs[idx][...])           # (H, 4H)
            whh.append(refs[idx + 1][...])       # (H, 4H)
            bias.append(refs[idx + 2][...])      # (1, 4H)
            idx += 3
        wfc = refs[idx][...]                     # (H, O_pad)   lane-dense (128-wide)
        bfc = refs[idx + 1][...]                 # (1, O_pad)
        out_ref = refs[idx + 2]                  # (T*B, O_pad)
        top_buf = refs[idx + 3]                  # VMEM scratch (T*B, H)

        # Layer-0 input projection for all timesteps at once (bias folded in).
        gates_x = jnp.dot(x_ref[...], wih0,
                          preferred_element_type=jnp.float32) + b0     # (T*B, 4H)

        lens = len_ref[...]                                            # (B, 1)
        # Hoist per-layer bias broadcasts out of the recurrence.
        bias_b = [jnp.broadcast_to(b, (B, 4 * H)) for b in bias]

        h = [jnp.zeros((B, H), jnp.float32) for _ in range(num_layers)]
        c = [jnp.zeros((B, H), jnp.float32) for _ in range(num_layers)]
        for t in range(T):
            valid_bh = jnp.broadcast_to(lens > t, (B, H))               # (B, H) bool
            # Static, sublane-aligned (8, 4H) slice; only the recurrent matmul
            # remains on the serial path for layer 0.
            g0 = gates_x[t * B:(t + 1) * B, :] + jnp.dot(
                h[0], whh0, preferred_element_type=jnp.float32)
            h[0], c[0] = cell(g0, h[0], c[0], valid_bh)
            inp = h[0]
            for l in range(1, num_layers):
                # Two accumulated dots instead of concat([inp, h]) @ stacked-W.
                g = (jnp.dot(inp, wih[l - 1], preferred_element_type=jnp.float32)
                     + jnp.dot(h[l], whh[l - 1], preferred_element_type=jnp.float32)
                     + bias_b[l - 1])
                h[l], c[l] = cell(g, h[l], c[l], valid_bh)
                inp = h[l]
            # pad_packed_sequence zeros padded timesteps of the top-layer output;
            # tile-aligned (8, H) store into the VMEM slab (vst slot, off crit path).
            top_buf[t * B:(t + 1) * B, :] = jnp.where(valid_bh, h[num_layers - 1], 0.0)

        # Single batched fc matmul + single unmasked lane-dense store.
        out_ref[...] = jnp.dot(top_buf[...], wfc,
                               preferred_element_type=jnp.float32) + bfc

    return kernel


def lstm_model_forward(x, seq_lengths, params, *, hidden, output_size, num_layers):
    """x: (B, T, D_in) float32, seq_lengths: (B,) int32 -> (B, T, output_size)."""
    B, T, D_in = x.shape
    H = hidden
    B_pad = max(8, ((B + 7) // 8) * 8)                 # sublane-aligned batch
    O_pad = max(128, ((output_size + 127) // 128) * 128)   # lane-dense output

    # Pre-scale the g-gate (slot 2) weight columns / bias by 2 so the kernel needs
    # only one sigmoid pass per cell (tanh(g) = 2*sigmoid(2g) - 1).
    def scale_g(w):
        return jnp.concatenate(
            [w[:, :2 * H], 2.0 * w[:, 2 * H:3 * H], w[:, 3 * H:]], axis=1)

    x_t = jnp.transpose(x, (1, 0, 2)).astype(jnp.float32)              # (T, B, D_in)
    x_t = jnp.pad(x_t, ((0, 0), (0, B_pad - B), (0, 0)))               # (T, B_pad, D_in)
    x_flat = x_t.reshape(T * B_pad, D_in)
    # Padded batch rows get length 0 -> state frozen at zero, masked out of the top
    # output, and sliced away outside the kernel.
    lens = jnp.pad(seq_lengths.astype(jnp.int32), (0, B_pad - B)).reshape(B_pad, 1)

    inputs = [lens, x_flat,
              scale_g(params["wih"][0]), scale_g(params["b"][0]),
              scale_g(params["whh"][0])]
    for l in range(1, num_layers):
        inputs += [scale_g(params["wih"][l]), scale_g(params["whh"][l]),
                   scale_g(params["b"][l])]
    wfc_pad = jnp.pad(params["wfc"], ((0, 0), (0, O_pad - output_size)))
    bfc_pad = jnp.pad(params["bfc"], ((0, 0), (0, O_pad - output_size)))
    inputs += [wfc_pad, bfc_pad]

    def full_spec(shape):
        nd = len(shape)
        return pl.BlockSpec(shape, lambda i, nd=nd: (0,) * nd)

    kernel = make_lstm_kernel(num_layers, H, B_pad, T)

    out_flat = pl.pallas_call(
        kernel,
        out_shape=jax.ShapeDtypeStruct((T * B_pad, O_pad), jnp.float32),
        grid=(1,),
        in_specs=[full_spec(a.shape) for a in inputs],
        out_specs=full_spec((T * B_pad, O_pad)),
        scratch_shapes=[pltpu.VMEM((T * B_pad, H), jnp.float32)],
        compiler_params=pltpu.CompilerParams(
            dimension_semantics=("arbitrary",)),
    )(*inputs)

    out = out_flat.reshape(T, B_pad, O_pad)[:, :B, :output_size]        # (T, B, O)
    return jnp.transpose(out, (1, 0, 2))                                 # (B, T, O)


def lstm_model_ref(x, seq_lengths, params, *, hidden, output_size, num_layers):
    """Pure-JAX reference of the same packed-LSTM + fc forward pass."""
    B, T, D_in = x.shape
    H = hidden
    h = jnp.zeros((num_layers, B, H), jnp.float32)
    c = jnp.zeros((num_layers, B, H), jnp.float32)
    outs = []
    for t in range(T):
        valid = (seq_lengths > t)[:, None]
        inp = x[:, t, :]
        for l in range(num_layers):
            gates = inp @ params["wih"][l] + h[l] @ params["whh"][l] + params["b"][l]
            i_g = jax.nn.sigmoid(gates[:, 0 * H:1 * H])
            f_g = jax.nn.sigmoid(gates[:, 1 * H:2 * H])
            g_g = jnp.tanh(gates[:, 2 * H:3 * H])
            o_g = jax.nn.sigmoid(gates[:, 3 * H:4 * H])
            cn = f_g * c[l] + i_g * g_g
            hn = o_g * jnp.tanh(cn)
            cn = jnp.where(valid, cn, c[l])
            hn = jnp.where(valid, hn, h[l])
            h = h.at[l].set(hn)
            c = c.at[l].set(cn)
            inp = hn
        top = jnp.where(valid, h[num_layers - 1], 0.0)
        outs.append(top @ params["wfc"] + params["bfc"])
    return jnp.stack(outs, axis=1)


def init_params(key, *, input_size, hidden, output_size, num_layers):
    """Deterministic uniform(-1/sqrt(H), 1/sqrt(H)) init, matching nn.LSTM's scheme."""
    bound = 1.0 / jnp.sqrt(jnp.float32(hidden))
    params = {"wih": [], "whh": [], "b": []}
    for l in range(num_layers):
        d_in = input_size if l == 0 else hidden
        key, k1, k2, k3, k4 = jax.random.split(key, 5)
        # stored already transposed: (d_in, 4H) and (H, 4H); gate order i, f, g, o
        params["wih"].append(jax.random.uniform(k1, (d_in, 4 * hidden), jnp.float32, -bound, bound))
        params["whh"].append(jax.random.uniform(k2, (hidden, 4 * hidden), jnp.float32, -bound, bound))
        b_ih = jax.random.uniform(k3, (1, 4 * hidden), jnp.float32, -bound, bound)
        b_hh = jax.random.uniform(k4, (1, 4 * hidden), jnp.float32, -bound, bound)
        params["b"].append(b_ih + b_hh)
    key, k5, k6 = jax.random.split(key, 3)
    fc_bound = 1.0 / jnp.sqrt(jnp.float32(hidden))
    params["wfc"] = jax.random.uniform(k5, (hidden, output_size), jnp.float32, -fc_bound, fc_bound)
    params["bfc"] = jax.random.uniform(k6, (1, output_size), jnp.float32, -fc_bound, fc_bound)
    return params


if __name__ == "__main__":
    B, T = 2, 8
    INPUT_SIZE, HIDDEN, OUTPUT_SIZE, NUM_LAYERS = 8, 32, 4, 2

    key = jax.random.PRNGKey(0)
    key, kx = jax.random.split(key)
    x = jax.random.normal(kx, (B, T, INPUT_SIZE), jnp.float32)
    seq_lengths = jnp.array([8, 5], dtype=jnp.int32)

    params = init_params(key, input_size=INPUT_SIZE, hidden=HIDDEN,
                         output_size=OUTPUT_SIZE, num_layers=NUM_LAYERS)

    fwd = functools.partial(lstm_model_forward, hidden=HIDDEN,
                            output_size=OUTPUT_SIZE, num_layers=NUM_LAYERS)
    out = jax.block_until_ready(fwd(x, seq_lengths, params))

    ref = lstm_model_ref(x, seq_lengths, params, hidden=HIDDEN,
                         output_size=OUTPUT_SIZE, num_layers=NUM_LAYERS)

    assert out.shape == (B, T, OUTPUT_SIZE)
    assert jnp.allclose(out, ref, rtol=1e-4, atol=1e-5), "mismatch vs reference"
    print("KERNEL_OK")
</pallas_src>

<mosaic_0001>
module attributes {stable_mosaic.version = 11 : i64} {
  func.func @kernel(%arg0: i32, %arg1: memref<8x1xi32, #tpu.memory_space<vmem>>, %arg2: memref<64x8xf32, #tpu.memory_space<vmem>>, %arg3: memref<8x128xf32, #tpu.memory_space<vmem>>, %arg4: memref<1x128xf32, #tpu.memory_space<vmem>>, %arg5: memref<32x128xf32, #tpu.memory_space<vmem>>, %arg6: memref<32x128xf32, #tpu.memory_space<vmem>>, %arg7: memref<32x128xf32, #tpu.memory_space<vmem>>, %arg8: memref<1x128xf32, #tpu.memory_space<vmem>>, %arg9: memref<32x128xf32, #tpu.memory_space<vmem>>, %arg10: memref<1x128xf32, #tpu.memory_space<vmem>>, %arg11: memref<64x128xf32, #tpu.memory_space<vmem>>, %arg12: memref<64x32xf32, #tpu.memory_space<vmem>>) attributes {dimension_semantics = [#tpu.dimension_semantics<arbitrary>], iteration_bounds = array<i64: 1>, scalar_prefetch = 0 : i64, scratch_operands = 1 : i64, tpu.core_type = #tpu.core_type<tc>, window_params = [{pipeline_mode = #tpu.pipeline_mode<synchronous>, transform_indices = @transform_0, window_bounds = array<i64: 8, 1>}, {pipeline_mode = #tpu.pipeline_mode<synchronous>, transform_indices = @transform_1, window_bounds = array<i64: 64, 8>}, {pipeline_mode = #tpu.pipeline_mode<synchronous>, transform_indices = @transform_2, window_bounds = array<i64: 8, 128>}, {pipeline_mode = #tpu.pipeline_mode<synchronous>, transform_indices = @transform_3, window_bounds = array<i64: 1, 128>}, {pipeline_mode = #tpu.pipeline_mode<synchronous>, transform_indices = @transform_4, window_bounds = array<i64: 32, 128>}, {pipeline_mode = #tpu.pipeline_mode<synchronous>, transform_indices = @transform_5, window_bounds = array<i64: 32, 128>}, {pipeline_mode = #tpu.pipeline_mode<synchronous>, transform_indices = @transform_6, window_bounds = array<i64: 32, 128>}, {pipeline_mode = #tpu.pipeline_mode<synchronous>, transform_indices = @transform_7, window_bounds = array<i64: 1, 128>}, {pipeline_mode = #tpu.pipeline_mode<synchronous>, transform_indices = @transform_8, window_bounds = array<i64: 32, 128>}, {pipeline_mode = #tpu.pipeline_mode<synchronous>, transform_indices = @transform_9, window_bounds = array<i64: 1, 128>}, {pipeline_mode = #tpu.pipeline_mode<synchronous>, transform_indices = @transform_10, window_bounds = array<i64: 64, 128>}]} {
    %c0 = arith.constant 0 : index
    %c0_0 = arith.constant 0 : index
    %0 = vector.load %arg3[%c0, %c0_0] : memref<8x128xf32, #tpu.memory_space<vmem>>, vector<8x128xf32>
    %c0_1 = arith.constant 0 : index
    %c0_2 = arith.constant 0 : index
    %1 = vector.load %arg4[%c0_1, %c0_2] : memref<1x128xf32, #tpu.memory_space<vmem>>, vector<1x128xf32>
    %c0_3 = arith.constant 0 : index
    %c0_4 = arith.constant 0 : index
    %2 = vector.load %arg5[%c0_3, %c0_4] : memref<32x128xf32, #tpu.memory_space<vmem>>, vector<32x128xf32>
    %c0_5 = arith.constant 0 : index
    %c0_6 = arith.constant 0 : index
    %3 = vector.load %arg6[%c0_5, %c0_6] : memref<32x128xf32, #tpu.memory_space<vmem>>, vector<32x128xf32>
    %c0_7 = arith.constant 0 : index
    %c0_8 = arith.constant 0 : index
    %4 = vector.load %arg7[%c0_7, %c0_8] : memref<32x128xf32, #tpu.memory_space<vmem>>, vector<32x128xf32>
    %c0_9 = arith.constant 0 : index
    %c0_10 = arith.constant 0 : index
    %5 = vector.load %arg8[%c0_9, %c0_10] : memref<1x128xf32, #tpu.memory_space<vmem>>, vector<1x128xf32>
    %c0_11 = arith.constant 0 : index
    %c0_12 = arith.constant 0 : index
    %6 = vector.load %arg9[%c0_11, %c0_12] : memref<32x128xf32, #tpu.memory_space<vmem>>, vector<32x128xf32>
    %c0_13 = arith.constant 0 : index
    %c0_14 = arith.constant 0 : index
    %7 = vector.load %arg10[%c0_13, %c0_14] : memref<1x128xf32, #tpu.memory_space<vmem>>, vector<1x128xf32>
    %c0_15 = arith.constant 0 : index
    %c0_16 = arith.constant 0 : index
    %8 = vector.load %arg2[%c0_15, %c0_16] : memref<64x8xf32, #tpu.memory_space<vmem>>, vector<64x8xf32>
    %cst = arith.constant dense<0.000000e+00> : vector<64x128xf32>
    %9 = tpu.matmul %8, %0, %cst {dimension_numbers = #tpu.dot_dimension_numbers<[1], [0], [0], [1], [0, 0, 1, 1], [], []>} : vector<64x8xf32>, vector<8x128xf32>, vector<64x128xf32> -> vector<64x128xf32>
    %10 = vector.broadcast %1 : vector<1x128xf32> to vector<64x128xf32>
    %11 = arith.addf %9, %10 : vector<64x128xf32>
    %c0_17 = arith.constant 0 : index
    %c0_18 = arith.constant 0 : index
    %12 = vector.load %arg1[%c0_17, %c0_18] : memref<8x1xi32, #tpu.memory_space<vmem>>, vector<8x1xi32>
    %13 = vector.shape_cast %5 : vector<1x128xf32> to vector<1x128xf32>
    %14 = vector.broadcast %13 : vector<1x128xf32> to vector<8x128xf32>
    %cst_19 = arith.constant 0.000000e+00 : f32
    %15 = vector.broadcast %cst_19 : f32 to vector<8x32xf32>
    %cst_20 = arith.constant 0.000000e+00 : f32
    %16 = vector.broadcast %cst_20 : f32 to vector<8x32xf32>
    %cst_21 = arith.constant 0.000000e+00 : f32
    %17 = vector.broadcast %cst_21 : f32 to vector<8x32xf32>
    %cst_22 = arith.constant 0.000000e+00 : f32
    %18 = vector.broadcast %cst_22 : f32 to vector<8x32xf32>
    %c0_i32 = arith.constant 0 : i32
    %19 = vector.broadcast %c0_i32 : i32 to vector<8x1xi32>
    %20 = arith.cmpi sgt, %12, %19 : vector<8x1xi32>
    %21 = vector.shape_cast %20 : vector<8x1xi1> to vector<8x1xi1>
    %22 = vector.broadcast %21 : vector<8x1xi1> to vector<8x32xi1>
    %23 = vector.extract_strided_slice %11 {offsets = [0, 0], sizes = [8, 128], strides = [1, 1]} : vector<64x128xf32> to vector<8x128xf32>
    %cst_23 = arith.constant dense<0.000000e+00> : vector<8x128xf32>
    %24 = tpu.matmul %15, %2, %cst_23 {dimension_numbers = #tpu.dot_dimension_numbers<[1], [0], [0], [1], [0, 0, 1, 1], [], []>} : vector<8x32xf32>, vector<32x128xf32>, vector<8x128xf32> -> vector<8x128xf32>
    %25 = arith.addf %23, %24 : vector<8x128xf32>
    %26 = arith.negf %25 : vector<8x128xf32>
    %27 = math.exp %26 : vector<8x128xf32>
    %cst_24 = arith.constant 1.000000e+00 : f32
    %28 = vector.broadcast %cst_24 : f32 to vector<8x128xf32>
    %29 = arith.addf %28, %27 : vector<8x128xf32>
    %30 = arith.divf %28, %29 : vector<8x128xf32>
    %31 = vector.extract_strided_slice %30 {offsets = [0, 0], sizes = [8, 32], strides = [1, 1]} : vector<8x128xf32> to vector<8x32xf32>
    %32 = vector.extract_strided_slice %30 {offsets = [0, 32], sizes = [8, 32], strides = [1, 1]} : vector<8x128xf32> to vector<8x32xf32>
    %33 = vector.extract_strided_slice %30 {offsets = [0, 64], sizes = [8, 32], strides = [1, 1]} : vector<8x128xf32> to vector<8x32xf32>
    %cst_25 = arith.constant 2.000000e+00 : f32
    %34 = vector.broadcast %cst_25 : f32 to vector<8x32xf32>
    %35 = arith.mulf %34, %33 : vector<8x32xf32>
    %cst_26 = arith.constant 1.000000e+00 : f32
    %36 = vector.broadcast %cst_26 : f32 to vector<8x32xf32>
    %37 = arith.subf %35, %36 : vector<8x32xf32>
    %38 = vector.extract_strided_slice %30 {offsets = [0, 96], sizes = [8, 32], strides = [1, 1]} : vector<8x128xf32> to vector<8x32xf32>
    %39 = arith.mulf %32, %17 : vector<8x32xf32>
    %40 = arith.mulf %31, %37 : vector<8x32xf32>
    %41 = arith.addf %39, %40 : vector<8x32xf32>
    %42 = math.tanh %41 : vector<8x32xf32>
    %43 = arith.mulf %38, %42 : vector<8x32xf32>
    %44 = arith.select %22, %41, %17 : vector<8x32xi1>, vector<8x32xf32>
    %45 = arith.select %22, %43, %15 : vector<8x32xi1>, vector<8x32xf32>
    %cst_27 = arith.constant dense<0.000000e+00> : vector<8x128xf32>
    %46 = tpu.matmul %45, %3, %cst_27 {dimension_numbers = #tpu.dot_dimension_numbers<[1], [0], [0], [1], [0, 0, 1, 1], [], []>} : vector<8x32xf32>, vector<32x128xf32>, vector<8x128xf32> -> vector<8x128xf32>
    %cst_28 = arith.constant dense<0.000000e+00> : vector<8x128xf32>
    %47 = tpu.matmul %16, %4, %cst_28 {dimension_numbers = #tpu.dot_dimension_numbers<[1], [0], [0], [1], [0, 0, 1, 1], [], []>} : vector<8x32xf32>, vector<32x128xf32>, vector<8x128xf32> -> vector<8x128xf32>
    %48 = arith.addf %46, %47 : vector<8x128xf32>
    %49 = arith.addf %48, %14 : vector<8x128xf32>
    %50 = arith.negf %49 : vector<8x128xf32>
    %51 = math.exp %50 : vector<8x128xf32>
    %cst_29 = arith.constant 1.000000e+00 : f32
    %52 = vector.broadcast %cst_29 : f32 to vector<8x128xf32>
    %53 = arith.addf %52, %51 : vector<8x128xf32>
    %54 = arith.divf %52, %53 : vector<8x128xf32>
    %55 = vector.extract_strided_slice %54 {offsets = [0, 0], sizes = [8, 32], strides = [1, 1]} : vector<8x128xf32> to vector<8x32xf32>
    %56 = vector.extract_strided_slice %54 {offsets = [0, 32], sizes = [8, 32], strides = [1, 1]} : vector<8x128xf32> to vector<8x32xf32>
    %57 = vector.extract_strided_slice %54 {offsets = [0, 64], sizes = [8, 32], strides = [1, 1]} : vector<8x128xf32> to vector<8x32xf32>
    %cst_30 = arith.constant 2.000000e+00 : f32
    %58 = vector.broadcast %cst_30 : f32 to vector<8x32xf32>
    %59 = arith.mulf %58, %57 : vector<8x32xf32>
    %cst_31 = arith.constant 1.000000e+00 : f32
    %60 = vector.broadcast %cst_31 : f32 to vector<8x32xf32>
    %61 = arith.subf %59, %60 : vector<8x32xf32>
    %62 = vector.extract_strided_slice %54 {offsets = [0, 96], sizes = [8, 32], strides = [1, 1]} : vector<8x128xf32> to vector<8x32xf32>
    %63 = arith.mulf %56, %18 : vector<8x32xf32>
    %64 = arith.mulf %55, %61 : vector<8x32xf32>
    %65 = arith.addf %63, %64 : vector<8x32xf32>
    %66 = math.tanh %65 : vector<8x32xf32>
    %67 = arith.mulf %62, %66 : vector<8x32xf32>
    %68 = arith.select %22, %65, %18 : vector<8x32xi1>, vector<8x32xf32>
    %69 = arith.select %22, %67, %16 : vector<8x32xi1>, vector<8x32xf32>
    %cst_32 = arith.constant 0.000000e+00 : f32
    %70 = vector.broadcast %cst_32 : f32 to vector<8x32xf32>
    %71 = arith.select %22, %69, %70 : vector<8x32xi1>, vector<8x32xf32>
    %c0_33 = arith.constant 0 : index
    %c0_34 = arith.constant 0 : index
    %72 = vector.load %arg12[%c0_33, %c0_34] : memref<64x32xf32, #tpu.memory_space<vmem>>, vector<8x32xf32>
    tpu.vector_store %arg12[%c0_33, %c0_34], %71 {strides = array<i32>} : memref<64x32xf32, #tpu.memory_space<vmem>>, vector<8x32xf32>,
    %c1_i32 = arith.constant 1 : i32
    %73 = vector.broadcast %c1_i32 : i32 to vector<8x1xi32>
    %74 = arith.cmpi sgt, %12, %73 : vector<8x1xi32>
    %75 = vector.shape_cast %74 : vector<8x1xi1> to vector<8x1xi1>
    %76 = vector.broadcast %75 : vector<8x1xi1> to vector<8x32xi1>
    %77 = vector.extract_strided_slice %11 {offsets = [8, 0], sizes = [8, 128], strides = [1, 1]} : vector<64x128xf32> to vector<8x128xf32>
    %cst_35 = arith.constant dense<0.000000e+00> : vector<8x128xf32>
    %78 = tpu.matmul %45, %2, %cst_35 {dimension_numbers = #tpu.dot_dimension_numbers<[1], [0], [0], [1], [0, 0, 1, 1], [], []>} : vector<8x32xf32>, vector<32x128xf32>, vector<8x128xf32> -> vector<8x128xf32>
    %79 = arith.addf %77, %78 : vector<8x128xf32>
    %80 = arith.negf %79 : vector<8x128xf32>
    %81 = math.exp %80 : vector<8x128xf32>
    %cst_36 = arith.constant 1.000000e+00 : f32
    %82 = vector.broadcast %cst_36 : f32 to vector<8x128xf32>
    %83 = arith.addf %82, %81 : vector<8x128xf32>
    %84 = arith.divf %82, %83 : vector<8x128xf32>
    %85 = vector.extract_strided_slice %84 {offsets = [0, 0], sizes = [8, 32], strides = [1, 1]} : vector<8x128xf32> to vector<8x32xf32>
    %86 = vector.extract_strided_slice %84 {offsets = [0, 32], sizes = [8, 32], strides = [1, 1]} : vector<8x128xf32> to vector<8x32xf32>
    %87 = vector.extract_strided_slice %84 {offsets = [0, 64], sizes = [8, 32], strides = [1, 1]} : vector<8x128xf32> to vector<8x32xf32>
    %cst_37 = arith.constant 2.000000e+00 : f32
    %88 = vector.broadcast %cst_37 : f32 to vector<8x32xf32>
    %89 = arith.mulf %88, %87 : vector<8x32xf32>
    %cst_38 = arith.constant 1.000000e+00 : f32
    %90 = vector.broadcast %cst_38 : f32 to vector<8x32xf32>
    %91 = arith.subf %89, %90 : vector<8x32xf32>
    %92 = vector.extract_strided_slice %84 {offsets = [0, 96], sizes = [8, 32], strides = [1, 1]} : vector<8x128xf32> to vector<8x32xf32>
    %93 = arith.mulf %86, %44 : vector<8x32xf32>
    %94 = arith.mulf %85, %91 : vector<8x32xf32>
    %95 = arith.addf %93, %94 : vector<8x32xf32>
    %96 = math.tanh %95 : vector<8x32xf32>
    %97 = arith.mulf %92, %96 : vector<8x32xf32>
    %98 = arith.select %76, %95, %44 : vector<8x32xi1>, vector<8x32xf32>
    %99 = arith.select %76, %97, %45 : vector<8x32xi1>, vector<8x32xf32>
    %cst_39 = arith.constant dense<0.000000e+00> : vector<8x128xf32>
    %100 = tpu.matmul %99, %3, %cst_39 {dimension_numbers = #tpu.dot_dimension_numbers<[1], [0], [0], [1], [0, 0, 1, 1], [], []>} : vector<8x32xf32>, vector<32x128xf32>, vector<8x128xf32> -> vector<8x128xf32>
    %cst_40 = arith.constant dense<0.000000e+00> : vector<8x128xf32>
    %101 = tpu.matmul %69, %4, %cst_40 {dimension_numbers = #tpu.dot_dimension_numbers<[1], [0], [0], [1], [0, 0, 1, 1], [], []>} : vector<8x32xf32>, vector<32x128xf32>, vector<8x128xf32> -> vector<8x128xf32>
    %102 = arith.addf %100, %101 : vector<8x128xf32>
    %103 = arith.addf %102, %14 : vector<8x128xf32>
    %104 = arith.negf %103 : vector<8x128xf32>
    %105 = math.exp %104 : vector<8x128xf32>
    %cst_41 = arith.constant 1.000000e+00 : f32
    %106 = vector.broadcast %cst_41 : f32 to vector<8x128xf32>
    %107 = arith.addf %106, %105 : vector<8x128xf32>
    %108 = arith.divf %106, %107 : vector<8x128xf32>
    %109 = vector.extract_strided_slice %108 {offsets = [0, 0], sizes = [8, 32], strides = [1, 1]} : vector<8x128xf32> to vector<8x32xf32>
    %110 = vector.extract_strided_slice %108 {offsets = [0, 32], sizes = [8, 32], strides = [1, 1]} : vector<8x128xf32> to vector<8x32xf32>
    %111 = vector.extract_strided_slice %108 {offsets = [0, 64], sizes = [8, 32], strides = [1, 1]} : vector<8x128xf32> to vector<8x32xf32>
    %cst_42 = arith.constant 2.000000e+00 : f32
    %112 = vector.broadcast %cst_42 : f32 to vector<8x32xf32>
    %113 = arith.mulf %112, %111 : vector<8x32xf32>
    %cst_43 = arith.constant 1.000000e+00 : f32
    %114 = vector.broadcast %cst_43 : f32 to vector<8x32xf32>
    %115 = arith.subf %113, %114 : vector<8x32xf32>
    %116 = vector.extract_strided_slice %108 {offsets = [0, 96], sizes = [8, 32], strides = [1, 1]} : vector<8x128xf32> to vector<8x32xf32>
    %117 = arith.mulf %110, %68 : vector<8x32xf32>
    %118 = arith.mulf %109, %115 : vector<8x32xf32>
    %119 = arith.addf %117, %118 : vector<8x32xf32>
    %120 = math.tanh %119 : vector<8x32xf32>
    %121 = arith.mulf %116, %120 : vector<8x32xf32>
    %122 = arith.select %76, %119, %68 : vector<8x32xi1>, vector<8x32xf32>
    %123 = arith.select %76, %121, %69 : vector<8x32xi1>, vector<8x32xf32>
    %cst_44 = arith.constant 0.000000e+00 : f32
    %124 = vector.broadcast %cst_44 : f32 to vector<8x32xf32>
    %125 = arith.select %76, %123, %124 : vector<8x32xi1>, vector<8x32xf32>
    %c8 = arith.constant 8 : index
    %c0_45 = arith.constant 0 : index
    %126 = vector.load %arg12[%c8, %c0_45] : memref<64x32xf32, #tpu.memory_space<vmem>>, vector<8x32xf32>
    tpu.vector_store %arg12[%c8, %c0_45], %125 {strides = array<i32>} : memref<64x32xf32, #tpu.memory_space<vmem>>, vector<8x32xf32>,
    %c2_i32 = arith.constant 2 : i32
    %127 = vector.broadcast %c2_i32 : i32 to vector<8x1xi32>
    %128 = arith.cmpi sgt, %12, %127 : vector<8x1xi32>
    %129 = vector.shape_cast %128 : vector<8x1xi1> to vector<8x1xi1>
    %130 = vector.broadcast %129 : vector<8x1xi1> to vector<8x32xi1>
    %131 = vector.extract_strided_slice %11 {offsets = [16, 0], sizes = [8, 128], strides = [1, 1]} : vector<64x128xf32> to vector<8x128xf32>
    %cst_46 = arith.constant dense<0.000000e+00> : vector<8x128xf32>
    %132 = tpu.matmul %99, %2, %cst_46 {dimension_numbers = #tpu.dot_dimension_numbers<[1], [0], [0], [1], [0, 0, 1, 1], [], []>} : vector<8x32xf32>, vector<32x128xf32>, vector<8x128xf32> -> vector<8x128xf32>
    %133 = arith.addf %131, %132 : vector<8x128xf32>
    %134 = arith.negf %133 : vector<8x128xf32>
    %135 = math.exp %134 : vector<8x128xf32>
    %cst_47 = arith.constant 1.000000e+00 : f32
    %136 = vector.broadcast %cst_47 : f32 to vector<8x128xf32>
    %137 = arith.addf %136, %135 : vector<8x128xf32>
    %138 = arith.divf %136, %137 : vector<8x128xf32>
    %139 = vector.extract_strided_slice %138 {offsets = [0, 0], sizes = [8, 32], strides = [1, 1]} : vector<8x128xf32> to vector<8x32xf32>
    %140 = vector.extract_strided_slice %138 {offsets = [0, 32], sizes = [8, 32], strides = [1, 1]} : vector<8x128xf32> to vector<8x32xf32>
    %141 = vector.extract_strided_slice %138 {offsets = [0, 64], sizes = [8, 32], strides = [1, 1]} : vector<8x128xf32> to vector<8x32xf32>
    %cst_48 = arith.constant 2.000000e+00 : f32
    %142 = vector.broadcast %cst_48 : f32 to vector<8x32xf32>
    %143 = arith.mulf %142, %141 : vector<8x32xf32>
    %cst_49 = arith.constant 1.000000e+00 : f32
    %144 = vector.broadcast %cst_49 : f32 to vector<8x32xf32>
    %145 = arith.subf %143, %144 : vector<8x32xf32>
    %146 = vector.extract_strided_slice %138 {offsets = [0, 96], sizes = [8, 32], strides = [1, 1]} : vector<8x128xf32> to vector<8x32xf32>
    %147 = arith.mulf %140, %98 : vector<8x32xf32>
    %148 = arith.mulf %139, %145 : vector<8x32xf32>
    %149 = arith.addf %147, %148 : vector<8x32xf32>
    %150 = math.tanh %149 : vector<8x32xf32>
    %151 = arith.mulf %146, %150 : vector<8x32xf32>
    %152 = arith.select %130, %149, %98 : vector<8x32xi1>, vector<8x32xf32>
    %153 = arith.select %130, %151, %99 : vector<8x32xi1>, vector<8x32xf32>
    %cst_50 = arith.constant dense<0.000000e+00> : vector<8x128xf32>
    %154 = tpu.matmul %153, %3, %cst_50 {dimension_numbers = #tpu.dot_dimension_numbers<[1], [0], [0], [1], [0, 0, 1, 1], [], []>} : vector<8x32xf32>, vector<32x128xf32>, vector<8x128xf32> -> vector<8x128xf32>
    %cst_51 = arith.constant dense<0.000000e+00> : vector<8x128xf32>
    %155 = tpu.matmul %123, %4, %cst_51 {dimension_numbers = #tpu.dot_dimension_numbers<[1], [0], [0], [1], [0, 0, 1, 1], [], []>} : vector<8x32xf32>, vector<32x128xf32>, vector<8x128xf32> -> vector<8x128xf32>
    %156 = arith.addf %154, %155 : vector<8x128xf32>
    %157 = arith.addf %156, %14 : vector<8x128xf32>
    %158 = arith.negf %157 : vector<8x128xf32>
    %159 = math.exp %158 : vector<8x128xf32>
    %cst_52 = arith.constant 1.000000e+00 : f32
    %160 = vector.broadcast %cst_52 : f32 to vector<8x128xf32>
    %161 = arith.addf %160, %159 : vector<8x128xf32>
    %162 = arith.divf %160, %161 : vector<8x128xf32>
    %163 = vector.extract_strided_slice %162 {offsets = [0, 0], sizes = [8, 32], strides = [1, 1]} : vector<8x128xf32> to vector<8x32xf32>
    %164 = vector.extract_strided_slice %162 {offsets = [0, 32], sizes = [8, 32], strides = [1, 1]} : vector<8x128xf32> to vector<8x32xf32>
    %165 = vector.extract_strided_slice %162 {offsets = [0, 64], sizes = [8, 32], strides = [1, 1]} : vector<8x128xf32> to vector<8x32xf32>
    %cst_53 = arith.constant 2.000000e+00 : f32
    %166 = vector.broadcast %cst_53 : f32 to vector<8x32xf32>
    %167 = arith.mulf %166, %165 : vector<8x32xf32>
    %cst_54 = arith.constant 1.000000e+00 : f32
    %168 = vector.broadcast %cst_54 : f32 to vector<8x32xf32>
    %169 = arith.subf %167, %168 : vector<8x32xf32>
    %170 = vector.extract_strided_slice %162 {offsets = [0, 96], sizes = [8, 32], strides = [1, 1]} : vector<8x128xf32> to vector<8x32xf32>
    %171 = arith.mulf %164, %122 : vector<8x32xf32>
    %172 = arith.mulf %163, %169 : vector<8x32xf32>
    %173 = arith.addf %171, %172 : vector<8x32xf32>
    %174 = math.tanh %173 : vector<8x32xf32>
    %175 = arith.mulf %170, %174 : vector<8x32xf32>
    %176 = arith.select %130, %173, %122 : vector<8x32xi1>, vector<8x32xf32>
    %177 = arith.select %130, %175, %123 : vector<8x32xi1>, vector<8x32xf32>
    %cst_55 = arith.constant 0.000000e+00 : f32
    %178 = vector.broadcast %cst_55 : f32 to vector<8x32xf32>
    %179 = arith.select %130, %177, %178 : vector<8x32xi1>, vector<8x32xf32>
    %c16 = arith.constant 16 : index
    %c0_56 = arith.constant 0 : index
    %180 = vector.load %arg12[%c16, %c0_56] : memref<64x32xf32, #tpu.memory_space<vmem>>, vector<8x32xf32>
    tpu.vector_store %arg12[%c16, %c0_56], %179 {strides = array<i32>} : memref<64x32xf32, #tpu.memory_space<vmem>>, vector<8x32xf32>,
    %c3_i32 = arith.constant 3 : i32
    %181 = vector.broadcast %c3_i32 : i32 to vector<8x1xi32>
    %182 = arith.cmpi sgt, %12, %181 : vector<8x1xi32>
    %183 = vector.shape_cast %182 : vector<8x1xi1> to vector<8x1xi1>
    %184 = vector.broadcast %183 : vector<8x1xi1> to vector<8x32xi1>
    %185 = vector.extract_strided_slice %11 {offsets = [24, 0], sizes = [8, 128], strides = [1, 1]} : vector<64x128xf32> to vector<8x128xf32>
    %cst_57 = arith.constant dense<0.000000e+00> : vector<8x128xf32>
    %186 = tpu.matmul %153, %2, %cst_57 {dimension_numbers = #tpu.dot_dimension_numbers<[1], [0], [0], [1], [0, 0, 1, 1], [], []>} : vector<8x32xf32>, vector<32x128xf32>, vector<8x128xf32> -> vector<8x128xf32>
    %187 = arith.addf %185, %186 : vector<8x128xf32>
    %188 = arith.negf %187 : vector<8x128xf32>
    %189 = math.exp %188 : vector<8x128xf32>
    %cst_58 = arith.constant 1.000000e+00 : f32
    %190 = vector.broadcast %cst_58 : f32 to vector<8x128xf32>
    %191 = arith.addf %190, %189 : vector<8x128xf32>
    %192 = arith.divf %190, %191 : vector<8x128xf32>
    %193 = vector.extract_strided_slice %192 {offsets = [0, 0], sizes = [8, 32], strides = [1, 1]} : vector<8x128xf32> to vector<8x32xf32>
    %194 = vector.extract_strided_slice %192 {offsets = [0, 32], sizes = [8, 32], strides = [1, 1]} : vector<8x128xf32> to vector<8x32xf32>
    %195 = vector.extract_strided_slice %192 {offsets = [0, 64], sizes = [8, 32], strides = [1, 1]} : vector<8x128xf32> to vector<8x32xf32>
    %cst_59 = arith.constant 2.000000e+00 : f32
    %196 = vector.broadcast %cst_59 : f32 to vector<8x32xf32>
    %197 = arith.mulf %196, %195 : vector<8x32xf32>
    %cst_60 = arith.constant 1.000000e+00 : f32
    %198 = vector.broadcast %cst_60 : f32 to vector<8x32xf32>
    %199 = arith.subf %197, %198 : vector<8x32xf32>
    %200 = vector.extract_strided_slice %192 {offsets = [0, 96], sizes = [8, 32], strides = [1, 1]} : vector<8x128xf32> to vector<8x32xf32>
    %201 = arith.mulf %194, %152 : vector<8x32xf32>
    %202 = arith.mulf %193, %199 : vector<8x32xf32>
    %203 = arith.addf %201, %202 : vector<8x32xf32>
    %204 = math.tanh %203 : vector<8x32xf32>
    %205 = arith.mulf %200, %204 : vector<8x32xf32>
    %206 = arith.select %184, %203, %152 : vector<8x32xi1>, vector<8x32xf32>
    %207 = arith.select %184, %205, %153 : vector<8x32xi1>, vector<8x32xf32>
    %cst_61 = arith.constant dense<0.000000e+00> : vector<8x128xf32>
    %208 = tpu.matmul %207, %3, %cst_61 {dimension_numbers = #tpu.dot_dimension_numbers<[1], [0], [0], [1], [0, 0, 1, 1], [], []>} : vector<8x32xf32>, vector<32x128xf32>, vector<8x128xf32> -> vector<8x128xf32>
    %cst_62 = arith.constant dense<0.000000e+00> : vector<8x128xf32>
    %209 = tpu.matmul %177, %4, %cst_62 {dimension_numbers = #tpu.dot_dimension_numbers<[1], [0], [0], [1], [0, 0, 1, 1], [], []>} : vector<8x32xf32>, vector<32x128xf32>, vector<8x128xf32> -> vector<8x128xf32>
    %210 = arith.addf %208, %209 : vector<8x128xf32>
    %211 = arith.addf %210, %14 : vector<8x128xf32>
    %212 = arith.negf %211 : vector<8x128xf32>
    %213 = math.exp %212 : vector<8x128xf32>
    %cst_63 = arith.constant 1.000000e+00 : f32
    %214 = vector.broadcast %cst_63 : f32 to vector<8x128xf32>
    %215 = arith.addf %214, %213 : vector<8x128xf32>
    %216 = arith.divf %214, %215 : vector<8x128xf32>
    %217 = vector.extract_strided_slice %216 {offsets = [0, 0], sizes = [8, 32], strides = [1, 1]} : vector<8x128xf32> to vector<8x32xf32>
    %218 = vector.extract_strided_slice %216 {offsets = [0, 32], sizes = [8, 32], strides = [1, 1]} : vector<8x128xf32> to vector<8x32xf32>
    %219 = vector.extract_strided_slice %216 {offsets = [0, 64], sizes = [8, 32], strides = [1, 1]} : vector<8x128xf32> to vector<8x32xf32>
    %cst_64 = arith.constant 2.000000e+00 : f32
    %220 = vector.broadcast %cst_64 : f32 to vector<8x32xf32>
    %221 = arith.mulf %220, %219 : vector<8x32xf32>
    %cst_65 = arith.constant 1.000000e+00 : f32
    %222 = vector.broadcast %cst_65 : f32 to vector<8x32xf32>
    %223 = arith.subf %221, %222 : vector<8x32xf32>
    %224 = vector.extract_strided_slice %216 {offsets = [0, 96], sizes = [8, 32], strides = [1, 1]} : vector<8x128xf32> to vector<8x32xf32>
    %225 = arith.mulf %218, %176 : vector<8x32xf32>
    %226 = arith.mulf %217, %223 : vector<8x32xf32>
    %227 = arith.addf %225, %226 : vector<8x32xf32>
    %228 = math.tanh %227 : vector<8x32xf32>
    %229 = arith.mulf %224, %228 : vector<8x32xf32>
    %230 = arith.select %184, %227, %176 : vector<8x32xi1>, vector<8x32xf32>
    %231 = arith.select %184, %229, %177 : vector<8x32xi1>, vector<8x32xf32>
    %cst_66 = arith.constant 0.000000e+00 : f32
    %232 = vector.broadcast %cst_66 : f32 to vector<8x32xf32>
    %233 = arith.select %184, %231, %232 : vector<8x32xi1>, vector<8x32xf32>
    %c24 = arith.constant 24 : index
    %c0_67 = arith.constant 0 : index
    %234 = vector.load %arg12[%c24, %c0_67] : memref<64x32xf32, #tpu.memory_space<vmem>>, vector<8x32xf32>
    tpu.vector_store %arg12[%c24, %c0_67], %233 {strides = array<i32>} : memref<64x32xf32, #tpu.memory_space<vmem>>, vector<8x32xf32>,
    %c4_i32 = arith.constant 4 : i32
    %235 = vector.broadcast %c4_i32 : i32 to vector<8x1xi32>
    %236 = arith.cmpi sgt, %12, %235 : vector<8x1xi32>
    %237 = vector.shape_cast %236 : vector<8x1xi1> to vector<8x1xi1>
    %238 = vector.broadcast %237 : vector<8x1xi1> to vector<8x32xi1>
    %239 = vector.extract_strided_slice %11 {offsets = [32, 0], sizes = [8, 128], strides = [1, 1]} : vector<64x128xf32> to vector<8x128xf32>
    %cst_68 = arith.constant dense<0.000000e+00> : vector<8x128xf32>
    %240 = tpu.matmul %207, %2, %cst_68 {dimension_numbers = #tpu.dot_dimension_numbers<[1], [0], [0], [1], [0, 0, 1, 1], [], []>} : vector<8x32xf32>, vector<32x128xf32>, vector<8x128xf32> -> vector<8x128xf32>
    %241 = arith.addf %239, %240 : vector<8x128xf32>
    %242 = arith.negf %241 : vector<8x128xf32>
    %243 = math.exp %242 : vector<8x128xf32>
    %cst_69 = arith.constant 1.000000e+00 : f32
    %244 = vector.broadcast %cst_69 : f32 to vector<8x128xf32>
    %245 = arith.addf %244, %243 : vector<8x128xf32>
    %246 = arith.divf %244, %245 : vector<8x128xf32>
    %247 = vector.extract_strided_slice %246 {offsets = [0, 0], sizes = [8, 32], strides = [1, 1]} : vector<8x128xf32> to vector<8x32xf32>
    %248 = vector.extract_strided_slice %246 {offsets = [0, 32], sizes = [8, 32], strides = [1, 1]} : vector<8x128xf32> to vector<8x32xf32>
    %249 = vector.extract_strided_slice %246 {offsets = [0, 64], sizes = [8, 32], strides = [1, 1]} : vector<8x128xf32> to vector<8x32xf32>
    %cst_70 = arith.constant 2.000000e+00 : f32
    %250 = vector.broadcast %cst_70 : f32 to vector<8x32xf32>
    %251 = arith.mulf %250, %249 : vector<8x32xf32>
    %cst_71 = arith.constant 1.000000e+00 : f32
    %252 = vector.broadcast %cst_71 : f32 to vector<8x32xf32>
    %253 = arith.subf %251, %252 : vector<8x32xf32>
    %254 = vector.extract_strided_slice %246 {offsets = [0, 96], sizes = [8, 32], strides = [1, 1]} : vector<8x128xf32> to vector<8x32xf32>
    %255 = arith.mulf %248, %206 : vector<8x32xf32>
    %256 = arith.mulf %247, %253 : vector<8x32xf32>
    %257 = arith.addf %255, %256 : vector<8x32xf32>
    %258 = math.tanh %257 : vector<8x32xf32>
    %259 = arith.mulf %254, %258 : vector<8x32xf32>
    %260 = arith.select %238, %257, %206 : vector<8x32xi1>, vector<8x32xf32>
    %261 = arith.select %238, %259, %207 : vector<8x32xi1>, vector<8x32xf32>
    %cst_72 = arith.constant dense<0.000000e+00> : vector<8x128xf32>
    %262 = tpu.matmul %261, %3, %cst_72 {dimension_numbers = #tpu.dot_dimension_numbers<[1], [0], [0], [1], [0, 0, 1, 1], [], []>} : vector<8x32xf32>, vector<32x128xf32>, vector<8x128xf32> -> vector<8x128xf32>
    %cst_73 = arith.constant dense<0.000000e+00> : vector<8x128xf32>
    %263 = tpu.matmul %231, %4, %cst_73 {dimension_numbers = #tpu.dot_dimension_numbers<[1], [0], [0], [1], [0, 0, 1, 1], [], []>} : vector<8x32xf32>, vector<32x128xf32>, vector<8x128xf32> -> vector<8x128xf32>
    %264 = arith.addf %262, %263 : vector<8x128xf32>
    %265 = arith.addf %264, %14 : vector<8x128xf32>
    %266 = arith.negf %265 : vector<8x128xf32>
    %267 = math.exp %266 : vector<8x128xf32>
    %cst_74 = arith.constant 1.000000e+00 : f32
    %268 = vector.broadcast %cst_74 : f32 to vector<8x128xf32>
    %269 = arith.addf %268, %267 : vector<8x128xf32>
    %270 = arith.divf %268, %269 : vector<8x128xf32>
    %271 = vector.extract_strided_slice %270 {offsets = [0, 0], sizes = [8, 32], strides = [1, 1]} : vector<8x128xf32> to vector<8x32xf32>
    %272 = vector.extract_strided_slice %270 {offsets = [0, 32], sizes = [8, 32], strides = [1, 1]} : vector<8x128xf32> to vector<8x32xf32>
    %273 = vector.extract_strided_slice %270 {offsets = [0, 64], sizes = [8, 32], strides = [1, 1]} : vector<8x128xf32> to vector<8x32xf32>
    %cst_75 = arith.constant 2.000000e+00 : f32
    %274 = vector.broadcast %cst_75 : f32 to vector<8x32xf32>
    %275 = arith.mulf %274, %273 : vector<8x32xf32>
    %cst_76 = arith.constant 1.000000e+00 : f32
    %276 = vector.broadcast %cst_76 : f32 to vector<8x32xf32>
    %277 = arith.subf %275, %276 : vector<8x32xf32>
    %278 = vector.extract_strided_slice %270 {offsets = [0, 96], sizes = [8, 32], strides = [1, 1]} : vector<8x128xf32> to vector<8x32xf32>
    %279 = arith.mulf %272, %230 : vector<8x32xf32>
    %280 = arith.mulf %271, %277 : vector<8x32xf32>
    %281 = arith.addf %279, %280 : vector<8x32xf32>
    %282 = math.tanh %281 : vector<8x32xf32>
    %283 = arith.mulf %278, %282 : vector<8x32xf32>
    %284 = arith.select %238, %281, %230 : vector<8x32xi1>, vector<8x32xf32>
    %285 = arith.select %238, %283, %231 : vector<8x32xi1>, vector<8x32xf32>
    %cst_77 = arith.constant 0.000000e+00 : f32
    %286 = vector.broadcast %cst_77 : f32 to vector<8x32xf32>
    %287 = arith.select %238, %285, %286 : vector<8x32xi1>, vector<8x32xf32>
    %c32 = arith.constant 32 : index
    %c0_78 = arith.constant 0 : index
    %288 = vector.load %arg12[%c32, %c0_78] : memref<64x32xf32, #tpu.memory_space<vmem>>, vector<8x32xf32>
    tpu.vector_store %arg12[%c32, %c0_78], %287 {strides = array<i32>} : memref<64x32xf32, #tpu.memory_space<vmem>>, vector<8x32xf32>,
    %c5_i32 = arith.constant 5 : i32
    %289 = vector.broadcast %c5_i32 : i32 to vector<8x1xi32>
    %290 = arith.cmpi sgt, %12, %289 : vector<8x1xi32>
    %291 = vector.shape_cast %290 : vector<8x1xi1> to vector<8x1xi1>
    %292 = vector.broadcast %291 : vector<8x1xi1> to vector<8x32xi1>
    %293 = vector.extract_strided_slice %11 {offsets = [40, 0], sizes = [8, 128], strides = [1, 1]} : vector<64x128xf32> to vector<8x128xf32>
    %cst_79 = arith.constant dense<0.000000e+00> : vector<8x128xf32>
    %294 = tpu.matmul %261, %2, %cst_79 {dimension_numbers = #tpu.dot_dimension_numbers<[1], [0], [0], [1], [0, 0, 1, 1], [], []>} : vector<8x32xf32>, vector<32x128xf32>, vector<8x128xf32> -> vector<8x128xf32>
    %295 = arith.addf %293, %294 : vector<8x128xf32>
    %296 = arith.negf %295 : vector<8x128xf32>
    %297 = math.exp %296 : vector<8x128xf32>
    %cst_80 = arith.constant 1.000000e+00 : f32
    %298 = vector.broadcast %cst_80 : f32 to vector<8x128xf32>
    %299 = arith.addf %298, %297 : vector<8x128xf32>
    %300 = arith.divf %298, %299 : vector<8x128xf32>
    %301 = vector.extract_strided_slice %300 {offsets = [0, 0], sizes = [8, 32], strides = [1, 1]} : vector<8x128xf32> to vector<8x32xf32>
    %302 = vector.extract_strided_slice %300 {offsets = [0, 32], sizes = [8, 32], strides = [1, 1]} : vector<8x128xf32> to vector<8x32xf32>
    %303 = vector.extract_strided_slice %300 {offsets = [0, 64], sizes = [8, 32], strides = [1, 1]} : vector<8x128xf32> to vector<8x32xf32>
    %cst_81 = arith.constant 2.000000e+00 : f32
    %304 = vector.broadcast %cst_81 : f32 to vector<8x32xf32>
    %305 = arith.mulf %304, %303 : vector<8x32xf32>
    %cst_82 = arith.constant 1.000000e+00 : f32
    %306 = vector.broadcast %cst_82 : f32 to vector<8x32xf32>
    %307 = arith.subf %305, %306 : vector<8x32xf32>
    %308 = vector.extract_strided_slice %300 {offsets = [0, 96], sizes = [8, 32], strides = [1, 1]} : vector<8x128xf32> to vector<8x32xf32>
    %309 = arith.mulf %302, %260 : vector<8x32xf32>
    %310 = arith.mulf %301, %307 : vector<8x32xf32>
    %311 = arith.addf %309, %310 : vector<8x32xf32>
    %312 = math.tanh %311 : vector<8x32xf32>
    %313 = arith.mulf %308, %312 : vector<8x32xf32>
    %314 = arith.select %292, %311, %260 : vector<8x32xi1>, vector<8x32xf32>
    %315 = arith.select %292, %313, %261 : vector<8x32xi1>, vector<8x32xf32>
    %cst_83 = arith.constant dense<0.000000e+00> : vector<8x128xf32>
    %316 = tpu.matmul %315, %3, %cst_83 {dimension_numbers = #tpu.dot_dimension_numbers<[1], [0], [0], [1], [0, 0, 1, 1], [], []>} : vector<8x32xf32>, vector<32x128xf32>, vector<8x128xf32> -> vector<8x128xf32>
    %cst_84 = arith.constant dense<0.000000e+00> : vector<8x128xf32>
    %317 = tpu.matmul %285, %4, %cst_84 {dimension_numbers = #tpu.dot_dimension_numbers<[1], [0], [0], [1], [0, 0, 1, 1], [], []>} : vector<8x32xf32>, vector<32x128xf32>, vector<8x128xf32> -> vector<8x128xf32>
    %318 = arith.addf %316, %317 : vector<8x128xf32>
    %319 = arith.addf %318, %14 : vector<8x128xf32>
    %320 = arith.negf %319 : vector<8x128xf32>
    %321 = math.exp %320 : vector<8x128xf32>
    %cst_85 = arith.constant 1.000000e+00 : f32
    %322 = vector.broadcast %cst_85 : f32 to vector<8x128xf32>
    %323 = arith.addf %322, %321 : vector<8x128xf32>
    %324 = arith.divf %322, %323 : vector<8x128xf32>
    %325 = vector.extract_strided_slice %324 {offsets = [0, 0], sizes = [8, 32], strides = [1, 1]} : vector<8x128xf32> to vector<8x32xf32>
    %326 = vector.extract_strided_slice %324 {offsets = [0, 32], sizes = [8, 32], strides = [1, 1]} : vector<8x128xf32> to vector<8x32xf32>
    %327 = vector.extract_strided_slice %324 {offsets = [0, 64], sizes = [8, 32], strides = [1, 1]} : vector<8x128xf32> to vector<8x32xf32>
    %cst_86 = arith.constant 2.000000e+00 : f32
    %328 = vector.broadcast %cst_86 : f32 to vector<8x32xf32>
    %329 = arith.mulf %328, %327 : vector<8x32xf32>
    %cst_87 = arith.constant 1.000000e+00 : f32
    %330 = vector.broadcast %cst_87 : f32 to vector<8x32xf32>
    %331 = arith.subf %329, %330 : vector<8x32xf32>
    %332 = vector.extract_strided_slice %324 {offsets = [0, 96], sizes = [8, 32], strides = [1, 1]} : vector<8x128xf32> to vector<8x32xf32>
    %333 = arith.mulf %326, %284 : vector<8x32xf32>
    %334 = arith.mulf %325, %331 : vector<8x32xf32>
    %335 = arith.addf %333, %334 : vector<8x32xf32>
    %336 = math.tanh %335 : vector<8x32xf32>
    %337 = arith.mulf %332, %336 : vector<8x32xf32>
    %338 = arith.select %292, %335, %284 : vector<8x32xi1>, vector<8x32xf32>
    %339 = arith.select %292, %337, %285 : vector<8x32xi1>, vector<8x32xf32>
    %cst_88 = arith.constant 0.000000e+00 : f32
    %340 = vector.broadcast %cst_88 : f32 to vector<8x32xf32>
    %341 = arith.select %292, %339, %340 : vector<8x32xi1>, vector<8x32xf32>
    %c40 = arith.constant 40 : index
    %c0_89 = arith.constant 0 : index
    %342 = vector.load %arg12[%c40, %c0_89] : memref<64x32xf32, #tpu.memory_space<vmem>>, vector<8x32xf32>
    tpu.vector_store %arg12[%c40, %c0_89], %341 {strides = array<i32>} : memref<64x32xf32, #tpu.memory_space<vmem>>, vector<8x32xf32>,
    %c6_i32 = arith.constant 6 : i32
    %343 = vector.broadcast %c6_i32 : i32 to vector<8x1xi32>
    %344 = arith.cmpi sgt, %12, %343 : vector<8x1xi32>
    %345 = vector.shape_cast %344 : vector<8x1xi1> to vector<8x1xi1>
    %346 = vector.broadcast %345 : vector<8x1xi1> to vector<8x32xi1>
    %347 = vector.extract_strided_slice %11 {offsets = [48, 0], sizes = [8, 128], strides = [1, 1]} : vector<64x128xf32> to vector<8x128xf32>
    %cst_90 = arith.constant dense<0.000000e+00> : vector<8x128xf32>
    %348 = tpu.matmul %315, %2, %cst_90 {dimension_numbers = #tpu.dot_dimension_numbers<[1], [0], [0], [1], [0, 0, 1, 1], [], []>} : vector<8x32xf32>, vector<32x128xf32>, vector<8x128xf32> -> vector<8x128xf32>
    %349 = arith.addf %347, %348 : vector<8x128xf32>
    %350 = arith.negf %349 : vector<8x128xf32>
    %351 = math.exp %350 : vector<8x128xf32>
    %cst_91 = arith.constant 1.000000e+00 : f32
    %352 = vector.broadcast %cst_91 : f32 to vector<8x128xf32>
    %353 = arith.addf %352, %351 : vector<8x128xf32>
    %354 = arith.divf %352, %353 : vector<8x128xf32>
    %355 = vector.extract_strided_slice %354 {offsets = [0, 0], sizes = [8, 32], strides = [1, 1]} : vector<8x128xf32> to vector<8x32xf32>
    %356 = vector.extract_strided_slice %354 {offsets = [0, 32], sizes = [8, 32], strides = [1, 1]} : vector<8x128xf32> to vector<8x32xf32>
    %357 = vector.extract_strided_slice %354 {offsets = [0, 64], sizes = [8, 32], strides = [1, 1]} : vector<8x128xf32> to vector<8x32xf32>
    %cst_92 = arith.constant 2.000000e+00 : f32
    %358 = vector.broadcast %cst_92 : f32 to vector<8x32xf32>
    %359 = arith.mulf %358, %357 : vector<8x32xf32>
    %cst_93 = arith.constant 1.000000e+00 : f32
    %360 = vector.broadcast %cst_93 : f32 to vector<8x32xf32>
    %361 = arith.subf %359, %360 : vector<8x32xf32>
    %362 = vector.extract_strided_slice %354 {offsets = [0, 96], sizes = [8, 32], strides = [1, 1]} : vector<8x128xf32> to vector<8x32xf32>
    %363 = arith.mulf %356, %314 : vector<8x32xf32>
    %364 = arith.mulf %355, %361 : vector<8x32xf32>
    %365 = arith.addf %363, %364 : vector<8x32xf32>
    %366 = math.tanh %365 : vector<8x32xf32>
    %367 = arith.mulf %362, %366 : vector<8x32xf32>
    %368 = arith.select %346, %365, %314 : vector<8x32xi1>, vector<8x32xf32>
    %369 = arith.select %346, %367, %315 : vector<8x32xi1>, vector<8x32xf32>
    %cst_94 = arith.constant dense<0.000000e+00> : vector<8x128xf32>
    %370 = tpu.matmul %369, %3, %cst_94 {dimension_numbers = #tpu.dot_dimension_numbers<[1], [0], [0], [1], [0, 0, 1, 1], [], []>} : vector<8x32xf32>, vector<32x128xf32>, vector<8x128xf32> -> vector<8x128xf32>
    %cst_95 = arith.constant dense<0.000000e+00> : vector<8x128xf32>
    %371 = tpu.matmul %339, %4, %cst_95 {dimension_numbers = #tpu.dot_dimension_numbers<[1], [0], [0], [1], [0, 0, 1, 1], [], []>} : vector<8x32xf32>, vector<32x128xf32>, vector<8x128xf32> -> vector<8x128xf32>
    %372 = arith.addf %370, %371 : vector<8x128xf32>
    %373 = arith.addf %372, %14 : vector<8x128xf32>
    %374 = arith.negf %373 : vector<8x128xf32>
    %375 = math.exp %374 : vector<8x128xf32>
    %cst_96 = arith.constant 1.000000e+00 : f32
    %376 = vector.broadcast %cst_96 : f32 to vector<8x128xf32>
    %377 = arith.addf %376, %375 : vector<8x128xf32>
    %378 = arith.divf %376, %377 : vector<8x128xf32>
    %379 = vector.extract_strided_slice %378 {offsets = [0, 0], sizes = [8, 32], strides = [1, 1]} : vector<8x128xf32> to vector<8x32xf32>
    %380 = vector.extract_strided_slice %378 {offsets = [0, 32], sizes = [8, 32], strides = [1, 1]} : vector<8x128xf32> to vector<8x32xf32>
    %381 = vector.extract_strided_slice %378 {offsets = [0, 64], sizes = [8, 32], strides = [1, 1]} : vector<8x128xf32> to vector<8x32xf32>
    %cst_97 = arith.constant 2.000000e+00 : f32
    %382 = vector.broadcast %cst_97 : f32 to vector<8x32xf32>
    %383 = arith.mulf %382, %381 : vector<8x32xf32>
    %cst_98 = arith.constant 1.000000e+00 : f32
    %384 = vector.broadcast %cst_98 : f32 to vector<8x32xf32>
    %385 = arith.subf %383, %384 : vector<8x32xf32>
    %386 = vector.extract_strided_slice %378 {offsets = [0, 96], sizes = [8, 32], strides = [1, 1]} : vector<8x128xf32> to vector<8x32xf32>
    %387 = arith.mulf %380, %338 : vector<8x32xf32>
    %388 = arith.mulf %379, %385 : vector<8x32xf32>
    %389 = arith.addf %387, %388 : vector<8x32xf32>
    %390 = math.tanh %389 : vector<8x32xf32>
    %391 = arith.mulf %386, %390 : vector<8x32xf32>
    %392 = arith.select %346, %389, %338 : vector<8x32xi1>, vector<8x32xf32>
    %393 = arith.select %346, %391, %339 : vector<8x32xi1>, vector<8x32xf32>
    %cst_99 = arith.constant 0.000000e+00 : f32
    %394 = vector.broadcast %cst_99 : f32 to vector<8x32xf32>
    %395 = arith.select %346, %393, %394 : vector<8x32xi1>, vector<8x32xf32>
    %c48 = arith.constant 48 : index
    %c0_100 = arith.constant 0 : index
    %396 = vector.load %arg12[%c48, %c0_100] : memref<64x32xf32, #tpu.memory_space<vmem>>, vector<8x32xf32>
    tpu.vector_store %arg12[%c48, %c0_100], %395 {strides = array<i32>} : memref<64x32xf32, #tpu.memory_space<vmem>>, vector<8x32xf32>,
    %c7_i32 = arith.constant 7 : i32
    %397 = vector.broadcast %c7_i32 : i32 to vector<8x1xi32>
    %398 = arith.cmpi sgt, %12, %397 : vector<8x1xi32>
    %399 = vector.shape_cast %398 : vector<8x1xi1> to vector<8x1xi1>
    %400 = vector.broadcast %399 : vector<8x1xi1> to vector<8x32xi1>
    %401 = vector.extract_strided_slice %11 {offsets = [56, 0], sizes = [8, 128], strides = [1, 1]} : vector<64x128xf32> to vector<8x128xf32>
    %cst_101 = arith.constant dense<0.000000e+00> : vector<8x128xf32>
    %402 = tpu.matmul %369, %2, %cst_101 {dimension_numbers = #tpu.dot_dimension_numbers<[1], [0], [0], [1], [0, 0, 1, 1], [], []>} : vector<8x32xf32>, vector<32x128xf32>, vector<8x128xf32> -> vector<8x128xf32>
    %403 = arith.addf %401, %402 : vector<8x128xf32>
    %404 = arith.negf %403 : vector<8x128xf32>
    %405 = math.exp %404 : vector<8x128xf32>
    %cst_102 = arith.constant 1.000000e+00 : f32
    %406 = vector.broadcast %cst_102 : f32 to vector<8x128xf32>
    %407 = arith.addf %406, %405 : vector<8x128xf32>
    %408 = arith.divf %406, %407 : vector<8x128xf32>
    %409 = vector.extract_strided_slice %408 {offsets = [0, 0], sizes = [8, 32], strides = [1, 1]} : vector<8x128xf32> to vector<8x32xf32>
    %410 = vector.extract_strided_slice %408 {offsets = [0, 32], sizes = [8, 32], strides = [1, 1]} : vector<8x128xf32> to vector<8x32xf32>
    %411 = vector.extract_strided_slice %408 {offsets = [0, 64], sizes = [8, 32], strides = [1, 1]} : vector<8x128xf32> to vector<8x32xf32>
    %cst_103 = arith.constant 2.000000e+00 : f32
    %412 = vector.broadcast %cst_103 : f32 to vector<8x32xf32>
    %413 = arith.mulf %412, %411 : vector<8x32xf32>
    %cst_104 = arith.constant 1.000000e+00 : f32
    %414 = vector.broadcast %cst_104 : f32 to vector<8x32xf32>
    %415 = arith.subf %413, %414 : vector<8x32xf32>
    %416 = vector.extract_strided_slice %408 {offsets = [0, 96], sizes = [8, 32], strides = [1, 1]} : vector<8x128xf32> to vector<8x32xf32>
    %417 = arith.mulf %410, %368 : vector<8x32xf32>
    %418 = arith.mulf %409, %415 : vector<8x32xf32>
    %419 = arith.addf %417, %418 : vector<8x32xf32>
    %420 = math.tanh %419 : vector<8x32xf32>
    %421 = arith.mulf %416, %420 : vector<8x32xf32>
    %422 = arith.select %400, %421, %369 : vector<8x32xi1>, vector<8x32xf32>
    %cst_105 = arith.constant dense<0.000000e+00> : vector<8x128xf32>
    %423 = tpu.matmul %422, %3, %cst_105 {dimension_numbers = #tpu.dot_dimension_numbers<[1], [0], [0], [1], [0, 0, 1, 1], [], []>} : vector<8x32xf32>, vector<32x128xf32>, vector<8x128xf32> -> vector<8x128xf32>
    %cst_106 = arith.constant dense<0.000000e+00> : vector<8x128xf32>
    %424 = tpu.matmul %393, %4, %cst_106 {dimension_numbers = #tpu.dot_dimension_numbers<[1], [0], [0], [1], [0, 0, 1, 1], [], []>} : vector<8x32xf32>, vector<32x128xf32>, vector<8x128xf32> -> vector<8x128xf32>
    %425 = arith.addf %423, %424 : vector<8x128xf32>
    %426 = arith.addf %425, %14 : vector<8x128xf32>
    %427 = arith.negf %426 : vector<8x128xf32>
    %428 = math.exp %427 : vector<8x128xf32>
    %cst_107 = arith.constant 1.000000e+00 : f32
    %429 = vector.broadcast %cst_107 : f32 to vector<8x128xf32>
    %430 = arith.addf %429, %428 : vector<8x128xf32>
    %431 = arith.divf %429, %430 : vector<8x128xf32>
    %432 = vector.extract_strided_slice %431 {offsets = [0, 0], sizes = [8, 32], strides = [1, 1]} : vector<8x128xf32> to vector<8x32xf32>
    %433 = vector.extract_strided_slice %431 {offsets = [0, 32], sizes = [8, 32], strides = [1, 1]} : vector<8x128xf32> to vector<8x32xf32>
    %434 = vector.extract_strided_slice %431 {offsets = [0, 64], sizes = [8, 32], strides = [1, 1]} : vector<8x128xf32> to vector<8x32xf32>
    %cst_108 = arith.constant 2.000000e+00 : f32
    %435 = vector.broadcast %cst_108 : f32 to vector<8x32xf32>
    %436 = arith.mulf %435, %434 : vector<8x32xf32>
    %cst_109 = arith.constant 1.000000e+00 : f32
    %437 = vector.broadcast %cst_109 : f32 to vector<8x32xf32>
    %438 = arith.subf %436, %437 : vector<8x32xf32>
    %439 = vector.extract_strided_slice %431 {offsets = [0, 96], sizes = [8, 32], strides = [1, 1]} : vector<8x128xf32> to vector<8x32xf32>
    %440 = arith.mulf %433, %392 : vector<8x32xf32>
    %441 = arith.mulf %432, %438 : vector<8x32xf32>
    %442 = arith.addf %440, %441 : vector<8x32xf32>
    %443 = math.tanh %442 : vector<8x32xf32>
    %444 = arith.mulf %439, %443 : vector<8x32xf32>
    %445 = arith.select %400, %444, %393 : vector<8x32xi1>, vector<8x32xf32>
    %cst_110 = arith.constant 0.000000e+00 : f32
    %446 = vector.broadcast %cst_110 : f32 to vector<8x32xf32>
    %447 = arith.select %400, %445, %446 : vector<8x32xi1>, vector<8x32xf32>
    %c56 = arith.constant 56 : index
    %c0_111 = arith.constant 0 : index
    %448 = vector.load %arg12[%c56, %c0_111] : memref<64x32xf32, #tpu.memory_space<vmem>>, vector<8x32xf32>
    tpu.vector_store %arg12[%c56, %c0_111], %447 {strides = array<i32>} : memref<64x32xf32, #tpu.memory_space<vmem>>, vector<8x32xf32>,
    %c0_112 = arith.constant 0 : index
    %c0_113 = arith.constant 0 : index
    %449 = vector.load %arg12[%c0_112, %c0_113] : memref<64x32xf32, #tpu.memory_space<vmem>>, vector<64x32xf32>
    %cst_114 = arith.constant dense<0.000000e+00> : vector<64x128xf32>
    %450 = tpu.matmul %449, %6, %cst_114 {dimension_numbers = #tpu.dot_dimension_numbers<[1], [0], [0], [1], [0, 0, 1, 1], [], []>} : vector<64x32xf32>, vector<32x128xf32>, vector<64x128xf32> -> vector<64x128xf32>
    %451 = vector.broadcast %7 : vector<1x128xf32> to vector<64x128xf32>
    %452 = arith.addf %450, %451 : vector<64x128xf32>
    %c0_115 = arith.constant 0 : index
    %c0_116 = arith.constant 0 : index
    %453 = vector.load %arg11[%c0_115, %c0_116] : memref<64x128xf32, #tpu.memory_space<vmem>>, vector<64x128xf32>
    tpu.vector_store %arg11[%c0_115, %c0_116], %452 {strides = array<i32>} : memref<64x128xf32, #tpu.memory_space<vmem>>, vector<64x128xf32>,
    return
  }
  func.func @transform_0(%arg0: i32) -> (i32, i32) {
    %c0_i32 = arith.constant 0 : i32
    %c0_i32_0 = arith.constant 0 : i32
    %c0_i32_1 = arith.constant 0 : i32
    return %c0_i32, %c0_i32_0 : i32, i32
  }
  func.func @transform_1(%arg0: i32) -> (i32, i32) {
    %c0_i32 = arith.constant 0 : i32
    %c0_i32_0 = arith.constant 0 : i32
    %c0_i32_1 = arith.constant 0 : i32
    return %c0_i32, %c0_i32_0 : i32, i32
  }
  func.func @transform_2(%arg0: i32) -> (i32, i32) {
    %c0_i32 = arith.constant 0 : i32
    %c0_i32_0 = arith.constant 0 : i32
    %c0_i32_1 = arith.constant 0 : i32
    return %c0_i32, %c0_i32_0 : i32, i32
  }
  func.func @transform_3(%arg0: i32) -> (i32, i32) {
    %c0_i32 = arith.constant 0 : i32
    %c0_i32_0 = arith.constant 0 : i32
    %c0_i32_1 = arith.constant 0 : i32
    return %c0_i32, %c0_i32_0 : i32, i32
  }
  func.func @transform_4(%arg0: i32) -> (i32, i32) {
    %c0_i32 = arith.constant 0 : i32
    %c0_i32_0 = arith.constant 0 : i32
    %c0_i32_1 = arith.constant 0 : i32
    return %c0_i32, %c0_i32_0 : i32, i32
  }
  func.func @transform_5(%arg0: i32) -> (i32, i32) {
    %c0_i32 = arith.constant 0 : i32
    %c0_i32_0 = arith.constant 0 : i32
    %c0_i32_1 = arith.constant 0 : i32
    return %c0_i32, %c0_i32_0 : i32, i32
  }
  func.func @transform_6(%arg0: i32) -> (i32, i32) {
    %c0_i32 = arith.constant 0 : i32
    %c0_i32_0 = arith.constant 0 : i32
    %c0_i32_1 = arith.constant 0 : i32
    return %c0_i32, %c0_i32_0 : i32, i32
  }
  func.func @transform_7(%arg0: i32) -> (i32, i32) {
    %c0_i32 = arith.constant 0 : i32
    %c0_i32_0 = arith.constant 0 : i32
    %c0_i32_1 = arith.constant 0 : i32
    return %c0_i32, %c0_i32_0 : i32, i32
  }
  func.func @transform_8(%arg0: i32) -> (i32, i32) {
    %c0_i32 = arith.constant 0 : i32
    %c0_i32_0 = arith.constant 0 : i32
    %c0_i32_1 = arith.constant 0 : i32
    return %c0_i32, %c0_i32_0 : i32, i32
  }
  func.func @transform_9(%arg0: i32) -> (i32, i32) {
    %c0_i32 = arith.constant 0 : i32
    %c0_i32_0 = arith.constant 0 : i32
    %c0_i32_1 = arith.constant 0 : i32
    return %c0_i32, %c0_i32_0 : i32, i32
  }
  func.func @transform_10(%arg0: i32) -> (i32, i32) {
    %c0_i32 = arith.constant 0 : i32
    %c0_i32_0 = arith.constant 0 : i32
    %c0_i32_1 = arith.constant 0 : i32
    return %c0_i32, %c0_i32_0 : i32, i32
  }
}

</mosaic_0001>

<bundles_post_ra>
// kernel: tpu_custom_call.1
= control target key start
LH: loop header
LB: loop body
LE: loop exit
PB: predicated region body
PF: predicated region fallthrough
CT: control target
= control target key end

     0   :  { %15 = vsyncpa [#allocation4], 0  ;;  %s4385_s0 = inlined_call_operand.vmem [shape: s32[8,1], index: 0, kind: input, shape index: {}]   ;;  %s4386_s1 = inlined_call_operand.vmem [shape: f32[64,8], index: 1, kind: input, shape index: {}]   ;;  %s4387_s2 = inlined_call_operand.hbm [shape: f32[8,128], index: 2, kind: input, shape index: {}]   ;;  %s4388_s3 = inlined_call_operand.hbm [shape: f32[1,128], index: 3, kind: input, shape index: {}]   ;;  %s4389_s4 = inlined_call_operand.vmem [shape: f32[32,128], index: 4, kind: input, shape index: {}]   ;;  %s4390_s5 = inlined_call_operand.vmem [shape: f32[32,128], index: 5, kind: input, shape index: {}]   ;;  %s4391_s6 = inlined_call_operand.vmem [shape: f32[32,128], index: 6, kind: input, shape index: {}]   ;;  %s4392_s7 = inlined_call_operand.vmem [shape: f32[1,128], index: 7, kind: input, shape index: {}]   ;;  %s4393_s8 = inlined_call_operand.hbm [shape: f32[32,128], index: 8, kind: input, shape index: {}]   ;;  %s4394_s9 = inlined_call_operand.vmem [shape: f32[1,128], index: 9, kind: input, shape index: {}]   ;;  %s4395_s10 = inlined_call_operand.hbm [shape: f32[64,128], index: 10, kind: output, shape index: {}]  }
   0x1   :  { %16 = vsyncpa [#allocation7], 0 }
   0x2   :  { %17 = vsyncpa [#allocation5], 0  ;;  %s3582_s13 = smov [#allocation6]   ;;  %s3583_s15 = smov [#allocation3]  }
   0x3   :  { %s38_s14 = sshll.u32 %s3582_s13, 4  ;;  %s28_s16 = sshll.u32 %s3583_s15, 4  ;;  %s39_s14 = int_to_ptr.vmem [resolvable:$true] %s38_s14  ;;  %s29_s16 = int_to_ptr.vmem [resolvable:$true] %s28_s16 }
   0x4   :  { %s3488_s19 = scalar_lea.hbm %s4388_s3, 16 }
   0x5   :  { %p3489_p0 = scmp.ne.s32.totalorder %s4388_s3, %s3488_s19  ;;  %p3492_p1 = scmp.lt.u32.totalorder %s3488_s19, %s4388_s3 }
   0x7   :  { %p3494_p2 = pnand %p3492_p1, %p3489_p0 }
   0x9   :  { %3497 = shalt.err (!%p3494_p2)
}
   0xa   :  { %s3498_s24 = scalar_lea.vmem %s39_s14, 16  ;;  %s3502_s25 = scalar_lea.vmem %s39_s14, 32 }
   0xb   :  { %p3499_p3 = scmp.ne.s32.totalorder %s39_s14, %s3498_s24  ;;  %p3503_p4 = scmp.lt.s32.totalorder %s39_s14, %s39_s14 }
   0xc   :  { %p3504_p5 = scmp.lt.s32.totalorder %s3502_s25, %s3498_s24 }
   0xe   :  { %p3505_p6 = por %p3504_p5, %p3503_p4 }
  0x10   :  { %p3506_p7 = pnand %p3505_p6, %p3499_p3 }
  0x12   :  { %3509 = shalt.err (!%p3506_p7)
}
  0x13   :  { %41 = dma.hbm_to_vmem [thread:$0]  %s4388_s3, 16, %s39_s14, [#allocation7]  }
  0x14   :  { %s3510_s30 = scalar_lea.hbm %s4387_s2, 128 }
  0x15   :  { %p3511_p8 = scmp.ne.s32.totalorder %s4387_s2, %s3510_s30  ;;  %p3514_p9 = scmp.lt.u32.totalorder %s3510_s30, %s4387_s2 }
  0x17   :  { %p3516_p10 = pnand %p3514_p9, %p3511_p8 }
  0x19   :  { %3519 = shalt.err (!%p3516_p10)
}
  0x1a   :  { %s3520_s17 = scalar_lea.vmem %s29_s16, 128  ;;  %p3525_p12 = scmp.lt.s32.totalorder %s29_s16, %s29_s16 }
  0x1b   :  { %p3521_p11 = scmp.ne.s32.totalorder %s29_s16, %s3520_s17  ;;  %p3526_p13 = scmp.lt.s32.totalorder %s3520_s17, %s3520_s17 }
  0x1d   :  { %p3527_p0 = por %p3526_p13, %p3525_p12 }
  0x1f   :  { %p3528_p1 = pnand %p3527_p0, %p3521_p11 }
  0x21   :  { %3531 = shalt.err (!%p3528_p1)
}
  0x22   :  { %31 = dma.hbm_to_vmem [thread:$0]  %s4387_s2, 128, %s29_s16, [#allocation4]  }
  0x23   :  { %s3584_s18 = smov [#allocation8]   ;;  %s3532_s22 = scalar_lea.hbm %s4393_s8, 512 }
  0x24   :  { %s55_s19 = sshll.u32 %s3584_s18, 4  ;;  %p3533_p2 = scmp.ne.s32.totalorder %s4393_s8, %s3532_s22  ;;  %s56_s19 = int_to_ptr.vmem [resolvable:$true] %s55_s19 }
  0x25   :  { %p3536_p3 = scmp.lt.u32.totalorder %s3532_s22, %s4393_s8 }
  0x27   :  { %p3538_p4 = pnand %p3536_p3, %p3533_p2 }
  0x29   :  { %3541 = shalt.err (!%p3538_p4)
}
  0x2a   :  { %s3542_s27 = scalar_lea.vmem %s56_s19, 512  ;;  %p3547_p6 = scmp.lt.s32.totalorder %s56_s19, %s56_s19 }
  0x2b   :  { %p3543_p5 = scmp.ne.s32.totalorder %s56_s19, %s3542_s27  ;;  %p3548_p7 = scmp.lt.s32.totalorder %s3542_s27, %s3542_s27 }
  0x2d   :  { %p3549_p8 = por %p3548_p7, %p3547_p6 }
  0x2f   :  { %p3550_p9 = pnand %p3549_p8, %p3543_p5 }
  0x31   :  { %3553 = shalt.err (!%p3550_p9)
}
  0x32   :  { %s3585_s2 = smov 128   ;;  %s3586_s16 = smov 8  }
  0x33   :  { %61 = dma.hbm_to_vmem [thread:$0]  %s4393_s8, 512, %s56_s19, [#allocation7], %s3585_s2, %s3585_s2, %s3586_s16  }
  0x34   :  { %3576 = dma.done.wait [#allocation4], 128  }
  0x35   :  { %3577 = vsyncadd [#allocation4], 4294967168 }
  0x36   :  { %3578 = dma.done.wait [#allocation7], 528  }
  0x37   :  { %3579 = vsyncadd [#allocation7], 4294966768  ;;  %vm107_vm0 = vcmask 64512   ;;  %v73_v0 = vld [vmem:[#allocation3] sm:$0xff]  ;;  %v97_v1 = vld [vmem:[%s4386_s1 + $0x20] sm:$0xff]  ;;  %v3587_v8 = vmov 0.0|0.0  }
  0x38   :  { %v98_v2 = vld [vmem:[%s4386_s1 + $0x28] sm:$0xff]  ;;  %3373 = vmatprep.subr.mxu1 %v73_v0  ;;  %2931 = vmatprep.mubr.msk.f32.mxu1 %vm107_vm0, %v97_v1  ;;  %v75_v3 = vld [vmem:[%s4389_s4] sm:$0xff]  ;;  %v99_v5 = vld [vmem:[%s4386_s1 + $0x30] sm:$0xff]  ;;  %vm3588_vm1 = vmmov 0   ;;  %v3589_v14 = vmov 0.0   ;;  %v3590_v16 = vmov 0  }
  0x39   :  { %v76_v4 = vld [vmem:[%s4389_s4 + $0x8] sm:$0xff]  ;;  %3374 = vmatpush3.msra.mxu1 %v73_v0  ;;  %2923 = vmatprep.subr.mxu0 %v73_v0  ;;  %v93_v7 = vld [vmem:[%s4386_s1] sm:$0xff]  ;;  %v77_v10 = vld [vmem:[%s4389_s4 + $0x10] sm:$0xff]  ;;  %s3591_s30 = smov 64   ;;  %s3592_s11 = smov 32   ;;  %vm250_vm4 = vcmask 261120  }
  0x3a   :  { %v3704_v6 = vpack.c.bf16 %v76_v4, %v75_v3  ;;  %2932 = vmatmul.mubr.msk.f32.vlgmr.msra.gmra.mrb[0].mxu1 %vm107_vm0, %v98_v2  ;;  %3221 = vmatprep.subr.bf16.mxu1 %v3587_v8  ;;  %v94_v9 = vld [vmem:[%s4386_s1 + $0x8] sm:$0xff]  ;;  %v78_v11 = vld [vmem:[%s4389_s4 + $0x18] sm:$0xff]  ;;  %v3742_v15 = vld [vmem:[%s4385_s0] sm:$0xff] }
  0x3b   :  { %2934 = vmatprep.mubr.msk.f32.mxu1 %vm107_vm0, %v99_v5  ;;  %v100_v12 = vld [vmem:[%s4386_s1 + $0x38] sm:$0xff]  ;;  %v3725_v13 = vpack.c.bf16 %v78_v11, %v77_v10  ;;  %2924 = vmatpush3.msra.mxu0 %v73_v0  ;;  %vm244_vm2 = vcmp.gt.s32.totalorder %v3742_v15, 0  ;;  %v83_v40 = vld [vmem:[%s4391_s6] sm:$0xff]  ;;  %v84_v41 = vld [vmem:[%s4391_s6 + $0x8] sm:$0xff]  ;;  %vm530_vm5 = vcmp.gt.s32.totalorder %v3742_v15, 1  ;;  %vm815_vm7 = vcmp.gt.s32.totalorder %v3742_v15, 2 }
  0x3c   :  { %3223 = vmatpush3.bf16.msra.mxu1 %v3704_v6  ;;  %2925 = vmatprep.mubr.msk.f32.mxu0 %vm107_vm0, %v93_v7  ;;  %v245_v17 = vsel %vm244_vm2, 1, %v3590_v16  ;;  %v3754_v21 = vld [vmem:[#allocation6] ss:$0 sm:$0xff]  ;;  %v85_v42 = vld [vmem:[%s4391_s6 + $0x10] sm:$0xff]  ;;  %v3775_v43 = vpack.c.bf16 %v84_v41, %v83_v40  ;;  %v79_v45 = vld [vmem:[%s4390_s5] sm:$0xff]  ;;  %vm1103_vm9 = vcmp.gt.s32.totalorder %v3742_v15, 3 }
  0x3d   :  { %3224 = vmatprep.subr.bf16.mxu1 %v3587_v8  ;;  %2926 = vmatmul.mubr.msk.f32.vlgmr.msra.gmra.mrb[0].mxu0 %vm107_vm0, %v94_v9  ;;  %v86_v44 = vld [vmem:[%s4391_s6 + $0x18] sm:$0xff]  ;;  %v80_v46 = vld [vmem:[%s4390_s5 + $0x8] sm:$0xff]  ;;  %v95_v48 = vld [vmem:[%s4386_s1 + $0x10] sm:$0xff]  ;;  %vm1391_vm11 = vcmp.gt.s32.totalorder %v3742_v15, 4  ;;  %vm1679_vm13 = vcmp.gt.s32.totalorder %v3742_v15, 5 }
  0x3e   :  { %2935 = vmatmul.mubr.msk.f32.gmra.mrb[2].mxu1 %vm107_vm0, %v100_v12  ;;  %3233 = vmatprep.subr.bf16.mxu0 %v3587_v8  ;;  %v3786_v47 = vpack.c.bf16 %v80_v46, %v79_v45  ;;  %v96_v49 = vld [vmem:[%s4386_s1 + $0x18] sm:$0xff]  ;;  %v81_v50 = vld [vmem:[%s4390_s5 + $0x10] sm:$0xff]  ;;  %v3798_v51 = vpack.c.bf16 %v86_v44, %v85_v42  ;;  %v3856_v1 = vld [vmem:[%s4392_s7] ss:$0 sm:$0xff] }
  0x3f   :  { %2945 = vmatprep.mubr.msk.f32.mxu1 %vm3588_vm1, %v3589_v14  ;;  %3387 = vset.pattern.permute.xlu1 %v3590_v16  ;;  %v82_v52 = vld [vmem:[%s4390_s5 + $0x18] sm:$0xff] }
  0x40   :  { %3226 = vmatpush3.bf16.msra.mxu1 %v3725_v13  ;;  %3388 = vset.pattern.permute.xlu0 %v3590_v16  ;;  %v3806_v53 = vpack.c.bf16 %v82_v52, %v81_v50 }
  0x41   :  { %3227 = vmatprep.subr.bf16.mxu1 %v3587_v8  ;;  %247 = vperm.xlu1 %3387, %v245_v17  }
  0x42   :  { %2928 = vmatprep.mubr.msk.f32.mxu0 %vm107_vm0, %v95_v48  ;;  %3235 = vmatpush3.bf16.msra.mxu0 %v3786_v47 }
  0x43   :  { %2946 = vmatmul.mubr.f32.vlgmr.msra.gmra.mrb[4].mxu1 %v3589_v14  ;;  %2929 = vmatmul.mubr.msk.f32.gmra.mrb[2].mxu0 %vm107_vm0, %v96_v49 }
  0x44   :  { %2956 = vmatprep.mubr.msk.f32.mxu1 %vm3588_vm1, %v3589_v14  ;;  %3229 = vmatpush3.bf16.msra.mxu1 %v3775_v43 }
  0x45   :  { %3230 = vmatprep.subr.bf16.mxu1 %v3587_v8  ;;  %3236 = vmatprep.subr.bf16.mxu0 %v3587_v8 }
  0x46   :  { %2967 = vmatprep.mubr.msk.f32.mxu0 %vm3588_vm1, %v3589_v14  ;;  %3238 = vmatpush3.bf16.msra.mxu0 %v3806_v53 }
  0x47   :  { %3245 = vmatprep.subr.bf16.mxu0 %v3587_v8 }
  0x48   :  { %3232 = vmatpush3.bf16.msra.mxu1 %v3798_v51 }
  0x49   :  { %3239 = vmatprep.subr.bf16.mxu1 %v3587_v8 }
  0x4b   :  { %2957 = vmatmul.mubr.f32.vlgmr.msra.gmra.mrb[6].mxu1 %v3589_v14 }
  0x4c   :  { %3241 = vmatpush3.bf16.msra.mxu1 %v3704_v6  ;;  %2978 = vmatprep.mubr.msk.f32.mxu1 %vm3588_vm1, %v3589_v14 }
  0x4d   :  { %3242 = vmatprep.subr.bf16.mxu1 %v3587_v8 }
  0x50   :  { %3244 = vmatpush3.bf16.msra.mxu1 %v3725_v13 }
  0x51   :  { %3251 = vmatprep.subr.bf16.mxu1 %v3587_v8 }
  0xc0   :  { %v3824_v55 = vpop.permute.xlu1 %247 }
  0xc1   :  { %vm249_vm3 = vcmp.eq.s32.totalorder %v3824_v55, 1 }
 0x10d   :  { %v3748_v18 = vpop.f32.mrb[0].mxu1 }
 0x10e   :  { %v3750_v19 = vpop.f32.mrb[1].mxu1 }
 0x110   :  { %v3752_v20 = vpop.f32.mrb[0].mxu0 }
 0x111   :  { %v3756_v22 = vpop.f32.mrb[2].mxu1  ;;  %v198_v23 = vpop.f32.mrb[1].mxu0  ;;  %v204_v0 = vadd.f32 %v3752_v20, %v3754_v21 }
 0x112   :  { %v3758_v24 = vpop.f32.mrb[3].mxu1  ;;  %v199_v25 = vadd.f32 %v3754_v21, %v198_v23 }
 0x116   :  { %v320_v26 = vpop.f32.mrb[4].mxu1  ;;  %v3833_v59 = vpop.f32.mrb[2].mxu0 }
 0x117   :  { %v324_v27 = vadd.f32 %v320_v26, %v199_v25  ;;  %v2947_v28 = vpop.f32.mrb[5].mxu1  ;;  %v3835_v60 = vpop.f32.mrb[3].mxu0 }
 0x119   :  { %v2719_v29 = vmul.f32 -1.442695, %v324_v27 }
 0x11b   :  { %3389 = vpow2.f32 %v2719_v29 }
 0x11e   :  { %v418_v61 = vpop.f32.mrb[6].mxu1 }
 0x11f   :  { %v2958_v62 = vpop.f32.mrb[7].mxu1 }
 0x125   :  { %v3390_v30 = vpop.eup %3389 }
 0x126   :  { %v328_v31 = vadd.f32 1.0, %v3390_v30 }
 0x128   :  { %3391 = vrcp.f32 %v328_v31 }
 0x132   :  { %v3392_v32 = vpop.eup %3391 }
 0x133   :  { %v331_v33 = vmul.f32 2.0, %v3392_v32  ;;  %v333_v37 = vmul.f32 0.0, %v3392_v32 }
 0x135   :  { %v2720_v34 = vadd.f32 -1.0, %v331_v33 }
 0x137   :  { %335 = vrot.lane.b32.xlu0 %v2720_v34, %s3591_s30 }
 0x1a9   :  { %v336_v35 = vpop.permute.xlu0 %335 }
 0x1aa   :  { %v338_v36 = vmul.f32 %v3392_v32, %v336_v35 }
 0x1ac   :  { %340 = vrot.lane.b32.xlu0 %v338_v36, %s3592_s11  ;;  %v531_v36 = vsel %vm530_vm5, 1, %v3590_v16 }
 0x21e   :  { %v341_v38 = vpop.permute.xlu0 %340 }
 0x21f   :  { %v3763_v39 = vadd.f32 %v341_v38, %v333_v37 }
 0x221   :  { %3393 = vtanh.f32 %v3763_v39  ;;  %v3868_v37 = vsel %vm249_vm3, %v3763_v39, 0.0 }
 0x22b   :  { %v3394_v54 = vpop.eup %3393 }
 0x22c   :  { %346 = vrot.lane.b32.xlu1 %v3394_v54, %s3591_s30 }
 0x29e   :  { %v347_v56 = vpop.permute.xlu1 %346 }
 0x29f   :  { %v349_v57 = vmul.f32 %v3392_v32, %v347_v56 }
 0x2a1   :  { %v3829_v58 = vsel %vm249_vm3, %v349_v57, 0.0 }
 0x2a2   :  { %423 = vrot.lane.b32.xlu0 %v3829_v58, %s3592_s11 }
 0x314   :  { %v424_v63 = vpop.permute.xlu0 %423 }
 0x315   :  { %2968 = vmatmul.mubr.msk.f32.vlgmr.msra.gmra.mrb[4].mxu0 %vm250_vm4, %v424_v63  ;;  %2979 = vmatmul.mubr.msk.f32.vlgmr.msra.gmra.mrb[8].mxu1 %vm250_vm4, %v424_v63 }
 0x316   :  { %3253 = vmatpush3.bf16.msra.mxu1 %v3786_v47  ;;  %3247 = vmatpush3.bf16.msra.mxu0 %v3775_v43 }
 0x317   :  { %3254 = vmatprep.subr.bf16.mxu1 %v3587_v8  ;;  %3248 = vmatprep.subr.bf16.mxu0 %v3587_v8 }
 0x318   :  { %3000 = vmatprep.mubr.msk.f32.mxu1 %vm3588_vm1, %v3589_v14  ;;  %2989 = vmatprep.mubr.msk.f32.mxu0 %vm3588_vm1, %v3589_v14 }
 0x31a   :  { %3256 = vmatpush3.bf16.msra.mxu1 %v3806_v53  ;;  %3250 = vmatpush3.bf16.msra.mxu0 %v3798_v51 }
 0x31b   :  { %3257 = vmatprep.subr.bf16.mxu0 %v3587_v8  ;;  %3263 = vmatprep.subr.bf16.mxu1 %v3587_v8 }
 0x3e8   :  { %v493_v2 = vpop.f32.mrb[4].mxu0  ;;  %v602_v3 = vpop.f32.mrb[8].mxu1 }
 0x3e9   :  { %v494_v4 = vadd.f32 %v493_v2, %v418_v61  ;;  %v606_v5 = vadd.f32 %v602_v3, %v204_v0  ;;  %v2969_v7 = vpop.f32.mrb[5].mxu0  ;;  %v2980_v9 = vpop.f32.mrb[9].mxu1 }
 0x3ea   :  { %v209_v7 = vadd.f32 %v3754_v21, %v3835_v60 }
 0x3eb   :  { %v497_v10 = vadd.f32 %v3856_v1, %v494_v4  ;;  %v2725_v11 = vmul.f32 -1.442695, %v606_v5 }
 0x3ed   :  { %v2722_v12 = vmul.f32 -1.442695, %v497_v10  ;;  %3395 = vpow2.f32 %v2725_v11 }
 0x3ef   :  { %3397 = vpow2.f32 %v2722_v12 }
 0x3f7   :  { %v3396_v17 = vpop.eup %3395 }
 0x3f8   :  { %v610_v23 = vadd.f32 1.0, %v3396_v17 }
 0x3f9   :  { %v3398_v20 = vpop.eup %3397 }
 0x3fa   :  { %v501_v25 = vadd.f32 1.0, %v3398_v20  ;;  %3399 = vrcp.f32 %v610_v23 }
 0x3fc   :  { %3401 = vrcp.f32 %v501_v25 }
 0x404   :  { %v3400_v26 = vpop.eup %3399 }
 0x405   :  { %v613_v27 = vmul.f32 2.0, %v3400_v26  ;;  %v615_v38 = vmul.f32 %v3400_v26, %v3868_v37 }
 0x406   :  { %v3402_v28 = vpop.eup %3401 }
 0x407   :  { %v2726_v29 = vadd.f32 -1.0, %v613_v27  ;;  %v504_v30 = vmul.f32 2.0, %v3402_v28  ;;  %v506_v42 = vmul.f32 0.0, %v3402_v28 }
 0x409   :  { %617 = vrot.lane.b32.xlu0 %v2726_v29, %s3591_s30  ;;  %v2723_v31 = vadd.f32 -1.0, %v504_v30 }
 0x40b   :  { %508 = vrot.lane.b32.xlu1 %v2723_v31, %s3591_s30 }
 0x47b   :  { %v618_v32 = vpop.permute.xlu0 %617 }
 0x47c   :  { %v620_v33 = vmul.f32 %v3400_v26, %v618_v32 }
 0x47d   :  { %v509_v34 = vpop.permute.xlu1 %508 }
 0x47e   :  { %v511_v35 = vmul.f32 %v3402_v28, %v509_v34  ;;  %622 = vrot.lane.b32.xlu0 %v620_v33, %s3592_s11  ;;  %v816_v33 = vsel %vm815_vm7, 1, %v3590_v16 }
 0x480   :  { %513 = vrot.lane.b32.xlu1 %v511_v35, %s3592_s11 }
 0x484   :  { %533 = vperm.xlu1 %3387, %v531_v36  }
 0x4f0   :  { %v623_v40 = vpop.permute.xlu0 %622 }
 0x4f1   :  { %v3871_v41 = vadd.f32 %v623_v40, %v615_v38 }
 0x4f2   :  { %v514_v44 = vpop.permute.xlu1 %513 }
 0x4f3   :  { %3403 = vtanh.f32 %v3871_v41  ;;  %v3874_v45 = vadd.f32 %v514_v44, %v506_v42 }
 0x4f5   :  { %3405 = vtanh.f32 %v3874_v45  ;;  %v3929_v36 = vsel %vm249_vm3, %v3874_v45, 0.0 }
 0x4fd   :  { %v3404_v46 = vpop.eup %3403 }
 0x4fe   :  { %628 = vrot.lane.b32.xlu1 %v3404_v46, %s3591_s30 }
 0x4ff   :  { %v3406_v48 = vpop.eup %3405 }
 0x500   :  { %519 = vrot.lane.b32.xlu0 %v3406_v48, %s3591_s30 }
 0x503   :  { %v3879_v39 = vpop.permute.xlu1 %533 }
 0x504   :  { %vm535_vm6 = vcmp.eq.s32.totalorder %v3879_v39, 1 }
 0x505   :  { %v3939_v44 = vsel %vm535_vm6, %v3871_v41, %v3868_v37 }
 0x570   :  { %v629_v49 = vpop.permute.xlu1 %628 }
 0x571   :  { %v631_v50 = vmul.f32 %v3400_v26, %v629_v49 }
 0x572   :  { %v520_v52 = vpop.permute.xlu0 %519 }
 0x573   :  { %v522_v54 = vmul.f32 %v3402_v28, %v520_v52  ;;  %v3885_v56 = vsel %vm535_vm6, %v631_v50, %v3829_v58 }
 0x574   :  { %707 = vrot.lane.b32.xlu1 %v3885_v56, %s3592_s11 }
 0x575   :  { %v3891_v57 = vsel %vm249_vm3, %v522_v54, 0.0 }
 0x576   :  { %526 = vrot.lane.b32.xlu0 %v3891_v57, %s3592_s11 }
 0x5e6   :  { %v708_v61 = vpop.permute.xlu1 %707 }
 0x5e7   :  { %3001 = vmatmul.mubr.msk.f32.vlgmr.msra.gmra.mrb[10].mxu1 %vm250_vm4, %v708_v61 }
 0x5e8   :  { %v527_v62 = vpop.permute.xlu0 %526  ;;  %3265 = vmatpush3.bf16.msra.mxu1 %v3775_v43  ;;  %3022 = vmatprep.mubr.msk.f32.mxu1 %vm3588_vm1, %v3589_v14 }
 0x5e9   :  { %529 = vst.msk [vmem:[#allocation2] sm:$0xff] %vm250_vm4, %v527_v62  ;;  %2990 = vmatmul.mubr.msk.f32.vlgmr.msra.gmra.mrb[6].mxu0 %vm250_vm4, %v527_v62  ;;  %3266 = vmatprep.subr.bf16.mxu1 %v3587_v8 }
 0x5ea   :  { %3259 = vmatpush3.bf16.msra.mxu0 %v3704_v6  ;;  %3011 = vmatprep.mubr.msk.f32.mxu0 %vm3588_vm1, %v3589_v14 }
 0x5eb   :  { %3260 = vmatprep.subr.bf16.mxu0 %v3587_v8 }
 0x5ec   :  { %3268 = vmatpush3.bf16.msra.mxu1 %v3798_v51 }
 0x5ed   :  { %3275 = vmatprep.subr.bf16.mxu1 %v3587_v8 }
 0x5ee   :  { %3262 = vmatpush3.bf16.msra.mxu0 %v3725_v13 }
 0x5ef   :  { %3269 = vmatprep.subr.bf16.mxu0 %v3587_v8 }
 0x5f1   :  { %3012 = vmatmul.mubr.msk.f32.vlgmr.msra.gmra.mrb[8].mxu0 %vm250_vm4, %v708_v61 }
 0x5f2   :  { %3271 = vmatpush3.bf16.msra.mxu0 %v3786_v47  ;;  %3033 = vmatprep.mubr.msk.f32.mxu0 %vm3588_vm1, %v3589_v14 }
 0x5f3   :  { %3272 = vmatprep.subr.bf16.mxu0 %v3587_v8 }
 0x5f6   :  { %3274 = vmatpush3.bf16.msra.mxu0 %v3806_v53 }
 0x5f7   :  { %3281 = vmatprep.subr.bf16.mxu0 %v3587_v8 }
 0x6ba   :  { %v777_v58 = vpop.f32.mrb[10].mxu1 }
 0x6bb   :  { %v3002_v63 = vpop.f32.mrb[11].mxu1 }
 0x6bc   :  { %v702_v0 = vpop.f32.mrb[6].mxu0 }
 0x6bd   :  { %v778_v2 = vadd.f32 %v777_v58, %v702_v0  ;;  %v2991_v3 = vpop.f32.mrb[7].mxu0 }
 0x6bf   :  { %v781_v4 = vadd.f32 %v3856_v1, %v778_v2  ;;  %v214_v2 = vadd.f32 %v3833_v59, %v3754_v21 }
 0x6c1   :  { %v2729_v5 = vmul.f32 -1.442695, %v781_v4 }
 0x6c3   :  { %3407 = vpow2.f32 %v2729_v5 }
 0x6c4   :  { %v887_v9 = vpop.f32.mrb[8].mxu0 }
 0x6c5   :  { %v891_v10 = vadd.f32 %v887_v9, %v209_v7  ;;  %v3013_v11 = vpop.f32.mrb[9].mxu0 }
 0x6c7   :  { %v2732_v12 = vmul.f32 -1.442695, %v891_v10 }
 0x6c9   :  { %3409 = vpow2.f32 %v2732_v12 }
 0x6cd   :  { %v3408_v17 = vpop.eup %3407 }
 0x6ce   :  { %v785_v23 = vadd.f32 1.0, %v3408_v17 }
 0x6d0   :  { %3411 = vrcp.f32 %v785_v23 }
 0x6d3   :  { %v3410_v20 = vpop.eup %3409 }
 0x6d4   :  { %v895_v25 = vadd.f32 1.0, %v3410_v20 }
 0x6d6   :  { %3413 = vrcp.f32 %v895_v25 }
 0x6da   :  { %v3412_v26 = vpop.eup %3411 }
 0x6db   :  { %v788_v27 = vmul.f32 2.0, %v3412_v26  ;;  %v790_v38 = vmul.f32 %v3412_v26, %v3929_v36 }
 0x6dd   :  { %v2730_v28 = vadd.f32 -1.0, %v788_v27 }
 0x6df   :  { %792 = vrot.lane.b32.xlu0 %v2730_v28, %s3591_s30 }
 0x6e0   :  { %v3414_v29 = vpop.eup %3413 }
 0x6e1   :  { %v898_v30 = vmul.f32 2.0, %v3414_v29  ;;  %v900_v46 = vmul.f32 %v3414_v29, %v3939_v44 }
 0x6e3   :  { %v2733_v60 = vadd.f32 -1.0, %v898_v30 }
 0x6e5   :  { %902 = vrot.lane.b32.xlu1 %v2733_v60, %s3591_s30 }
 0x751   :  { %v793_v31 = vpop.permute.xlu0 %792 }
 0x752   :  { %v795_v32 = vmul.f32 %v3412_v26, %v793_v31 }
 0x754   :  { %797 = vrot.lane.b32.xlu0 %v795_v32, %s3592_s11 }
 0x757   :  { %v903_v34 = vpop.permute.xlu1 %902 }
 0x758   :  { %v905_v35 = vmul.f32 %v3414_v29, %v903_v34  ;;  %818 = vperm.xlu0 %3388, %v816_v33   ;;  %v1104_v34 = vsel %vm1103_vm9, 1, %v3590_v16 }
 0x75a   :  { %907 = vrot.lane.b32.xlu1 %v905_v35, %s3592_s11 }
 0x7c6   :  { %v798_v40 = vpop.permute.xlu0 %797 }
 0x7c7   :  { %v3932_v42 = vadd.f32 %v798_v40, %v790_v38 }
 0x7c9   :  { %3415 = vtanh.f32 %v3932_v42  ;;  %v4001_v35 = vsel %vm535_vm6, %v3932_v42, %v3929_v36 }
 0x7cc   :  { %v908_v48 = vpop.permute.xlu1 %907 }
 0x7cd   :  { %v3942_v49 = vadd.f32 %v908_v48, %v900_v46 }
 0x7cf   :  { %3417 = vtanh.f32 %v3942_v49 }
 0x7d3   :  { %v3416_v55 = vpop.eup %3415 }
 0x7d4   :  { %803 = vrot.lane.b32.xlu1 %v3416_v55, %s3591_s30 }
 0x7d7   :  { %v3957_v41 = vpop.permute.xlu0 %818 }
 0x7d8   :  { %vm820_vm8 = vcmp.eq.s32.totalorder %v3957_v41, 1 }
 0x7d9   :  { %v3418_v45 = vpop.eup %3417  ;;  %v4007_v38 = vsel %vm820_vm8, %v3942_v49, %v3939_v44 }
 0x7da   :  { %913 = vrot.lane.b32.xlu1 %v3418_v45, %s3591_s30 }
 0x846   :  { %v804_v50 = vpop.permute.xlu1 %803 }
 0x847   :  { %v3947_v52 = vmul.f32 %v3412_v26, %v804_v50 }
 0x849   :  { %v3953_v37 = vsel %vm535_vm6, %v3947_v52, %v3891_v57 }
 0x84a   :  { %920 = vrot.lane.b32.xlu0 %v3953_v37, %s3592_s11 }
 0x84c   :  { %v914_v54 = vpop.permute.xlu1 %913 }
 0x84d   :  { %v916_v61 = vmul.f32 %v3414_v29, %v914_v54 }
 0x84f   :  { %v3963_v62 = vsel %vm820_vm8, %v916_v61, %v3885_v56 }
 0x850   :  { %995 = vrot.lane.b32.xlu1 %v3963_v62, %s3592_s11 }
 0x8bc   :  { %v921_v58 = vpop.permute.xlu0 %920 }
 0x8bd   :  { %3023 = vmatmul.mubr.msk.f32.vlgmr.msra.gmra.mrb[12].mxu1 %vm250_vm4, %v921_v58 }
 0x8be   :  { %3277 = vmatpush3.bf16.msra.mxu1 %v3704_v6  ;;  %3044 = vmatprep.mubr.msk.f32.mxu1 %vm3588_vm1, %v3589_v14 }
 0x8bf   :  { %3278 = vmatprep.subr.bf16.mxu1 %v3587_v8 }
 0x8c2   :  { %3280 = vmatpush3.bf16.msra.mxu1 %v3725_v13  ;;  %v996_v57 = vpop.permute.xlu1 %995 }
 0x8c3   :  { %3034 = vmatmul.mubr.msk.f32.vlgmr.msra.gmra.mrb[10].mxu0 %vm250_vm4, %v996_v57  ;;  %3287 = vmatprep.subr.bf16.mxu1 %v3587_v8 }
 0x8c4   :  { %3283 = vmatpush3.bf16.msra.mxu0 %v3775_v43  ;;  %3055 = vmatprep.mubr.msk.f32.mxu0 %vm3588_vm1, %v3589_v14 }
 0x8c5   :  { %3045 = vmatmul.mubr.msk.f32.vlgmr.msra.gmra.mrb[14].mxu1 %vm250_vm4, %v996_v57  ;;  %3284 = vmatprep.subr.bf16.mxu0 %v3587_v8 }
 0x8c6   :  { %3289 = vmatpush3.bf16.msra.mxu1 %v3786_v47  ;;  %3066 = vmatprep.mubr.msk.f32.mxu1 %vm3588_vm1, %v3589_v14 }
 0x8c7   :  { %3290 = vmatprep.subr.bf16.mxu1 %v3587_v8 }
 0x8c8   :  { %3286 = vmatpush3.bf16.msra.mxu0 %v3798_v51 }
 0x8c9   :  { %3293 = vmatprep.subr.bf16.mxu0 %v3587_v8 }
 0x8ca   :  { %3292 = vmatpush3.bf16.msra.mxu1 %v3806_v53 }
 0x8cb   :  { %3299 = vmatprep.subr.bf16.mxu1 %v3587_v8 }
 0x990   :  { %v990_v56 = vpop.f32.mrb[12].mxu1 }
 0x991   :  { %v3024_v63 = vpop.f32.mrb[13].mxu1 }
 0x996   :  { %v1065_v0 = vpop.f32.mrb[10].mxu0 }
 0x997   :  { %v1066_v3 = vadd.f32 %v1065_v0, %v990_v56  ;;  %v3035_v4 = vpop.f32.mrb[11].mxu0 }
 0x998   :  { %v1175_v5 = vpop.f32.mrb[14].mxu1 }
 0x999   :  { %v1069_v7 = vadd.f32 %v3856_v1, %v1066_v3  ;;  %v1179_v9 = vadd.f32 %v1175_v5, %v214_v2  ;;  %v3046_v10 = vpop.f32.mrb[15].mxu1 }
 0x99b   :  { %v2736_v11 = vmul.f32 -1.442695, %v1069_v7  ;;  %v2739_v12 = vmul.f32 -1.442695, %v1179_v9  ;;  %v219_v9 = vadd.f32 %v3754_v21, %v3750_v19 }
 0x99d   :  { %3419 = vpow2.f32 %v2736_v11 }
 0x99e   :  { %3421 = vpow2.f32 %v2739_v12 }
 0x9a7   :  { %v3420_v17 = vpop.eup %3419 }
 0x9a8   :  { %v3422_v23 = vpop.eup %3421  ;;  %v1073_v20 = vadd.f32 1.0, %v3420_v17 }
 0x9a9   :  { %v1183_v25 = vadd.f32 1.0, %v3422_v23 }
 0x9aa   :  { %3423 = vrcp.f32 %v1073_v20 }
 0x9ab   :  { %3425 = vrcp.f32 %v1183_v25 }
 0x9b4   :  { %v3424_v26 = vpop.eup %3423 }
 0x9b5   :  { %v3426_v27 = vpop.eup %3425  ;;  %v1076_v59 = vmul.f32 2.0, %v3424_v26  ;;  %v1078_v40 = vmul.f32 %v3424_v26, %v4001_v35 }
 0x9b6   :  { %v1186_v28 = vmul.f32 2.0, %v3426_v27  ;;  %v1188_v46 = vmul.f32 %v3426_v27, %v4007_v38 }
 0x9b7   :  { %v2737_v29 = vadd.f32 -1.0, %v1076_v59 }
 0x9b8   :  { %v2740_v30 = vadd.f32 -1.0, %v1186_v28 }
 0x9b9   :  { %1080 = vrot.lane.b32.xlu0 %v2737_v29, %s3591_s30 }
 0x9ba   :  { %1190 = vrot.lane.b32.xlu1 %v2740_v30, %s3591_s30 }
 0xa2b   :  { %v1081_v60 = vpop.permute.xlu0 %1080 }
 0xa2c   :  { %v1191_v31 = vpop.permute.xlu1 %1190  ;;  %v1083_v32 = vmul.f32 %v3424_v26, %v1081_v60 }
 0xa2d   :  { %v1193_v33 = vmul.f32 %v3426_v27, %v1191_v31 }
 0xa2e   :  { %1085 = vrot.lane.b32.xlu0 %v1083_v32, %s3592_s11  ;;  %v1392_v32 = vsel %vm1391_vm11, 1, %v3590_v16 }
 0xa2f   :  { %1195 = vrot.lane.b32.xlu1 %v1193_v33, %s3592_s11 }
 0xa32   :  { %1106 = vperm.xlu0 %3388, %v1104_v34  }
 0xaa0   :  { %v1086_v48 = vpop.permute.xlu0 %1085 }
 0xaa1   :  { %v1196_v55 = vpop.permute.xlu1 %1195  ;;  %v4011_v45 = vadd.f32 %v1086_v48, %v1078_v40 }
 0xaa2   :  { %v4013_v50 = vadd.f32 %v1196_v55, %v1188_v46 }
 0xaa3   :  { %3427 = vtanh.f32 %v4011_v45  ;;  %v4073_v40 = vsel %vm820_vm8, %v4011_v45, %v4001_v35 }
 0xaa4   :  { %3429 = vtanh.f32 %v4013_v50 }
 0xaad   :  { %v3428_v36 = vpop.eup %3427 }
 0xaae   :  { %v3430_v42 = vpop.eup %3429  ;;  %1091 = vrot.lane.b32.xlu1 %v3428_v36, %s3591_s30 }
 0xaaf   :  { %1201 = vrot.lane.b32.xlu0 %v3430_v42, %s3591_s30 }
 0xab1   :  { %v4019_v44 = vpop.permute.xlu0 %1106 }
 0xab2   :  { %vm1108_vm10 = vcmp.eq.s32.totalorder %v4019_v44, 1 }
 0xab3   :  { %v4083_v36 = vsel %vm1108_vm10, %v4013_v50, %v4007_v38 }
 0xb20   :  { %v1092_v49 = vpop.permute.xlu1 %1091 }
 0xb21   :  { %v4021_v54 = vmul.f32 %v3424_v26, %v1092_v49  ;;  %v1202_v61 = vpop.permute.xlu0 %1201 }
 0xb22   :  { %v1204_v58 = vmul.f32 %v3426_v27, %v1202_v61 }
 0xb23   :  { %v4028_v57 = vsel %vm820_vm8, %v4021_v54, %v3953_v37 }
 0xb24   :  { %1208 = vrot.lane.b32.xlu1 %v4028_v57, %s3592_s11  ;;  %v4035_v56 = vsel %vm1108_vm10, %v1204_v58, %v3963_v62 }
 0xb25   :  { %1283 = vrot.lane.b32.xlu0 %v4035_v56, %s3592_s11 }
 0xb96   :  { %v1209_v63 = vpop.permute.xlu1 %1208 }
 0xb97   :  { %v1284_v0 = vpop.permute.xlu0 %1283  ;;  %3056 = vmatmul.mubr.msk.f32.vlgmr.msra.gmra.mrb[12].mxu0 %vm250_vm4, %v1209_v63 }
 0xb98   :  { %3067 = vmatmul.mubr.msk.f32.vlgmr.msra.gmra.mrb[16].mxu1 %vm250_vm4, %v1284_v0  ;;  %3295 = vmatpush3.bf16.msra.mxu0 %v3704_v6 }
 0xb99   :  { %3296 = vmatprep.subr.bf16.mxu0 %v3587_v8  ;;  %3077 = vmatprep.mubr.msk.f32.mxu0 %vm3588_vm1, %v3589_v14 }
 0xb9a   :  { %3301 = vmatpush3.bf16.msra.mxu1 %v3775_v43  ;;  %3088 = vmatprep.mubr.msk.f32.mxu1 %vm3588_vm1, %v3589_v14 }
 0xb9b   :  { %3302 = vmatprep.subr.bf16.mxu1 %v3587_v8 }
 0xb9c   :  { %3298 = vmatpush3.bf16.msra.mxu0 %v3725_v13 }
 0xb9d   :  { %3305 = vmatprep.subr.bf16.mxu0 %v3587_v8 }
 0xb9e   :  { %3304 = vmatpush3.bf16.msra.mxu1 %v3798_v51 }
 0xb9f   :  { %3078 = vmatmul.mubr.msk.f32.vlgmr.msra.gmra.mrb[14].mxu0 %vm250_vm4, %v1284_v0  ;;  %3311 = vmatprep.subr.bf16.mxu1 %v3587_v8 }
 0xba0   :  { %3307 = vmatpush3.bf16.msra.mxu0 %v3786_v47  ;;  %3099 = vmatprep.mubr.msk.f32.mxu0 %vm3588_vm1, %v3589_v14 }
 0xba1   :  { %3308 = vmatprep.subr.bf16.mxu0 %v3587_v8 }
 0xba4   :  { %3310 = vmatpush3.bf16.msra.mxu0 %v3806_v53 }
 0xba5   :  { %3317 = vmatprep.subr.bf16.mxu0 %v3587_v8 }
 0xc6a   :  { %v1278_v37 = vpop.f32.mrb[12].mxu0 }
 0xc6b   :  { %v1353_v62 = vpop.f32.mrb[16].mxu1  ;;  %v3057_v2 = vpop.f32.mrb[13].mxu0 }
 0xc6c   :  { %v1354_v3 = vadd.f32 %v1353_v62, %v1278_v37  ;;  %v3068_v4 = vpop.f32.mrb[17].mxu1 }
 0xc6e   :  { %v1357_v5 = vadd.f32 %v3856_v1, %v1354_v3 }
 0xc70   :  { %v2743_v7 = vmul.f32 -1.442695, %v1357_v5 }
 0xc72   :  { %3431 = vpow2.f32 %v2743_v7  ;;  %v1463_v10 = vpop.f32.mrb[14].mxu0 }
 0xc73   :  { %v1467_v11 = vadd.f32 %v1463_v10, %v219_v9  ;;  %v3079_v12 = vpop.f32.mrb[15].mxu0  ;;  %v224_v9 = vadd.f32 %v3748_v18, %v3754_v21 }
 0xc75   :  { %v2746_v17 = vmul.f32 -1.442695, %v1467_v11 }
 0xc77   :  { %3433 = vpow2.f32 %v2746_v17 }
 0xc7c   :  { %v3432_v23 = vpop.eup %3431 }
 0xc7d   :  { %v1361_v20 = vadd.f32 1.0, %v3432_v23 }
 0xc7f   :  { %3435 = vrcp.f32 %v1361_v20 }
 0xc81   :  { %v3434_v25 = vpop.eup %3433 }
 0xc82   :  { %v1471_v26 = vadd.f32 1.0, %v3434_v25 }
 0xc84   :  { %3437 = vrcp.f32 %v1471_v26 }
 0xc89   :  { %v3436_v27 = vpop.eup %3435 }
 0xc8a   :  { %v1364_v59 = vmul.f32 2.0, %v3436_v27  ;;  %v1366_v46 = vmul.f32 %v3436_v27, %v4073_v40 }
 0xc8c   :  { %v2744_v28 = vadd.f32 -1.0, %v1364_v59 }
 0xc8e   :  { %v3438_v29 = vpop.eup %3437  ;;  %1368 = vrot.lane.b32.xlu1 %v2744_v28, %s3591_s30 }
 0xc8f   :  { %v1474_v30 = vmul.f32 2.0, %v3438_v29  ;;  %v1476_v42 = vmul.f32 %v3438_v29, %v4083_v36 }
 0xc91   :  { %v2747_v19 = vadd.f32 -1.0, %v1474_v30 }
 0xc93   :  { %1478 = vrot.lane.b32.xlu0 %v2747_v19, %s3591_s30 }
 0xd00   :  { %v1369_v60 = vpop.permute.xlu1 %1368 }
 0xd01   :  { %v1371_v31 = vmul.f32 %v3436_v27, %v1369_v60 }
 0xd03   :  { %1373 = vrot.lane.b32.xlu1 %v1371_v31, %s3592_s11 }
 0xd05   :  { %v1479_v33 = vpop.permute.xlu0 %1478 }
 0xd06   :  { %v1481_v34 = vmul.f32 %v3438_v29, %v1479_v33 }
 0xd07   :  { %1394 = vperm.xlu1 %3387, %v1392_v32  }
 0xd08   :  { %1483 = vrot.lane.b32.xlu0 %v1481_v34, %s3592_s11 }
 0xd75   :  { %v1374_v48 = vpop.permute.xlu1 %1373 }
 0xd76   :  { %v4076_v55 = vadd.f32 %v1374_v48, %v1366_v46  ;;  %v1680_v46 = vsel %vm1679_vm13, 1, %v3590_v16 }
 0xd78   :  { %3439 = vtanh.f32 %v4076_v55  ;;  %v4145_v48 = vsel %vm1108_vm10, %v4076_v55, %v4073_v40 }
 0xd7a   :  { %v1484_v49 = vpop.permute.xlu0 %1483 }
 0xd7b   :  { %v4086_v61 = vadd.f32 %v1484_v49, %v1476_v42 }
 0xd7d   :  { %3441 = vtanh.f32 %v4086_v61 }
 0xd82   :  { %v3440_v35 = vpop.eup %3439 }
 0xd83   :  { %1379 = vrot.lane.b32.xlu0 %v3440_v35, %s3591_s30 }
 0xd86   :  { %v4091_v63 = vpop.permute.xlu1 %1394 }
 0xd87   :  { %v3442_v45 = vpop.eup %3441  ;;  %vm1396_vm12 = vcmp.eq.s32.totalorder %v4091_v63, 1 }
 0xd88   :  { %1489 = vrot.lane.b32.xlu1 %v3442_v45, %s3591_s30  ;;  %v4151_v42 = vsel %vm1396_vm12, %v4086_v61, %v4083_v36 }
 0xdf5   :  { %v1380_v58 = vpop.permute.xlu0 %1379 }
 0xdf6   :  { %v4093_v0 = vmul.f32 %v3436_v27, %v1380_v58 }
 0xdf8   :  { %v4099_v38 = vsel %vm1108_vm10, %v4093_v0, %v4028_v57 }
 0xdf9   :  { %1496 = vrot.lane.b32.xlu0 %v4099_v38, %s3592_s11 }
 0xdfa   :  { %v1490_v50 = vpop.permute.xlu1 %1489 }
 0xdfb   :  { %v1492_v37 = vmul.f32 %v3438_v29, %v1490_v50 }
 0xdfd   :  { %v4107_v62 = vsel %vm1396_vm12, %v1492_v37, %v4035_v56 }
 0xdfe   :  { %1571 = vrot.lane.b32.xlu1 %v4107_v62, %s3592_s11 }
 0xe6b   :  { %v1497_v2 = vpop.permute.xlu0 %1496 }
 0xe6c   :  { %3089 = vmatmul.mubr.msk.f32.vlgmr.msra.gmra.mrb[18].mxu1 %vm250_vm4, %v1497_v2 }
 0xe6d   :  { %3313 = vmatpush3.bf16.msra.mxu1 %v3704_v6  ;;  %3110 = vmatprep.mubr.msk.f32.mxu1 %vm3588_vm1, %v3589_v14 }
 0xe6e   :  { %3314 = vmatprep.subr.bf16.mxu1 %v3587_v8 }
 0xe70   :  { %v1572_v57 = vpop.permute.xlu1 %1571 }
 0xe71   :  { %3316 = vmatpush3.bf16.msra.mxu1 %v3725_v13  ;;  %3100 = vmatmul.mubr.msk.f32.vlgmr.msra.gmra.mrb[16].mxu0 %vm250_vm4, %v1572_v57 }
 0xe72   :  { %3319 = vmatpush3.bf16.msra.mxu0 %v3775_v43  ;;  %3323 = vmatprep.subr.bf16.mxu1 %v3587_v8 }
 0xe73   :  { %3320 = vmatprep.subr.bf16.mxu0 %v3587_v8  ;;  %3121 = vmatprep.mubr.msk.f32.mxu0 %vm3588_vm1, %v3589_v14 }
 0xe74   :  { %3111 = vmatmul.mubr.msk.f32.vlgmr.msra.gmra.mrb[20].mxu1 %vm250_vm4, %v1572_v57 }
 0xe75   :  { %3325 = vmatpush3.bf16.msra.mxu1 %v3786_v47  ;;  %3132 = vmatprep.mubr.msk.f32.mxu1 %vm3588_vm1, %v3589_v14 }
 0xe76   :  { %3322 = vmatpush3.bf16.msra.mxu0 %v3798_v51  ;;  %3326 = vmatprep.subr.bf16.mxu1 %v3587_v8 }
 0xe77   :  { %3329 = vmatprep.subr.bf16.mxu0 %v3587_v8 }
 0xe79   :  { %3328 = vmatpush3.bf16.msra.mxu1 %v3806_v53 }
 0xe7a   :  { %3335 = vmatprep.subr.bf16.mxu1 %v3587_v8 }
 0xf3f   :  { %v1566_v56 = vpop.f32.mrb[18].mxu1 }
 0xf40   :  { %v3090_v3 = vpop.f32.mrb[19].mxu1 }
 0xf44   :  { %v1641_v4 = vpop.f32.mrb[16].mxu0 }
 0xf45   :  { %v1642_v5 = vadd.f32 %v1641_v4, %v1566_v56  ;;  %v3101_v7 = vpop.f32.mrb[17].mxu0 }
 0xf47   :  { %v1645_v10 = vadd.f32 %v3856_v1, %v1642_v5  ;;  %v1751_v11 = vpop.f32.mrb[20].mxu1 }
 0xf48   :  { %v1755_v12 = vadd.f32 %v1751_v11, %v224_v9  ;;  %v3112_v17 = vpop.f32.mrb[21].mxu1 }
 0xf49   :  { %v2750_v23 = vmul.f32 -1.442695, %v1645_v10  ;;  %v229_v17 = vadd.f32 %v3754_v21, %v3758_v24 }
 0xf4a   :  { %v2753_v20 = vmul.f32 -1.442695, %v1755_v12 }
 0xf4b   :  { %3443 = vpow2.f32 %v2750_v23 }
 0xf4c   :  { %3445 = vpow2.f32 %v2753_v20 }
 0xf55   :  { %v3444_v25 = vpop.eup %3443 }
 0xf56   :  { %v3446_v26 = vpop.eup %3445  ;;  %v1649_v27 = vadd.f32 1.0, %v3444_v25 }
 0xf57   :  { %v1759_v59 = vadd.f32 1.0, %v3446_v26 }
 0xf58   :  { %3447 = vrcp.f32 %v1649_v27 }
 0xf59   :  { %3449 = vrcp.f32 %v1759_v59 }
 0xf62   :  { %v3448_v28 = vpop.eup %3447 }
 0xf63   :  { %v3450_v29 = vpop.eup %3449  ;;  %v1652_v30 = vmul.f32 2.0, %v3448_v28  ;;  %v1654_v15 = vmul.f32 %v3448_v28, %v4145_v48 }
 0xf64   :  { %v1762_v19 = vmul.f32 2.0, %v3450_v29  ;;  %v1764_v49 = vmul.f32 %v3450_v29, %v4151_v42 }
 0xf65   :  { %v2751_v18 = vadd.f32 -1.0, %v1652_v30 }
 0xf66   :  { %v2754_v60 = vadd.f32 -1.0, %v1762_v19 }
 0xf67   :  { %1656 = vrot.lane.b32.xlu0 %v2751_v18, %s3591_s30 }
 0xf68   :  { %1766 = vrot.lane.b32.xlu1 %v2754_v60, %s3591_s30 }
 0xfd9   :  { %v1657_v31 = vpop.permute.xlu0 %1656 }
 0xfda   :  { %v1767_v32 = vpop.permute.xlu1 %1766  ;;  %v1659_v33 = vmul.f32 %v3448_v28, %v1657_v31 }
 0xfdb   :  { %v1769_v34 = vmul.f32 %v3450_v29, %v1767_v32 }
 0xfdc   :  { %1661 = vrot.lane.b32.xlu0 %v1659_v33, %s3592_s11  ;;  %v4212_v33 = vld [vmem:[%s4385_s0] sm:$0xff] }
 0xfdd   :  { %1771 = vrot.lane.b32.xlu1 %v1769_v34, %s3592_s11  ;;  %vm1967_vm15 = vcmp.gt.s32.totalorder %v4212_v33, 6 }
 0xfde   :  { %v1968_v34 = vsel %vm1967_vm15, 1, %v3590_v16 }
 0xfe0   :  { %1682 = vperm.xlu0 %3388, %v1680_v46  }
0x104e   :  { %v1662_v35 = vpop.permute.xlu0 %1661 }
0x104f   :  { %v1772_v45 = vpop.permute.xlu1 %1771  ;;  %v4155_v58 = vadd.f32 %v1662_v35, %v1654_v15 }
0x1050   :  { %v4157_v50 = vadd.f32 %v1772_v45, %v1764_v49 }
0x1051   :  { %3451 = vtanh.f32 %v4155_v58  ;;  %v4222_v49 = vsel %vm1396_vm12, %v4155_v58, %v4145_v48 }
0x1052   :  { %3453 = vtanh.f32 %v4157_v50 }
0x105b   :  { %v3452_v40 = vpop.eup %3451 }
0x105c   :  { %v3454_v55 = vpop.eup %3453  ;;  %1667 = vrot.lane.b32.xlu1 %v3452_v40, %s3591_s30 }
0x105d   :  { %1777 = vrot.lane.b32.xlu0 %v3454_v55, %s3591_s30 }
0x105f   :  { %v4163_v36 = vpop.permute.xlu0 %1682 }
0x1060   :  { %vm1684_vm14 = vcmp.eq.s32.totalorder %v4163_v36, 1 }
0x1061   :  { %v4232_v55 = vsel %vm1684_vm14, %v4157_v50, %v4151_v42 }
0x10ce   :  { %v1668_v61 = vpop.permute.xlu1 %1667 }
0x10cf   :  { %v4165_v37 = vmul.f32 %v3448_v28, %v1668_v61  ;;  %v1778_v2 = vpop.permute.xlu0 %1777 }
0x10d0   :  { %v1780_v57 = vmul.f32 %v3450_v29, %v1778_v2 }
0x10d1   :  { %v4172_v56 = vsel %vm1396_vm12, %v4165_v37, %v4099_v38 }
0x10d2   :  { %1784 = vrot.lane.b32.xlu1 %v4172_v56, %s3592_s11  ;;  %v4179_v3 = vsel %vm1684_vm14, %v1780_v57, %v4107_v62 }
0x10d3   :  { %1859 = vrot.lane.b32.xlu0 %v4179_v3, %s3592_s11 }
0x1144   :  { %v1785_v4 = vpop.permute.xlu1 %1784 }
0x1145   :  { %v1860_v5 = vpop.permute.xlu0 %1859  ;;  %3122 = vmatmul.mubr.msk.f32.vlgmr.msra.gmra.mrb[18].mxu0 %vm250_vm4, %v1785_v4 }
0x1146   :  { %3133 = vmatmul.mubr.msk.f32.vlgmr.msra.gmra.mrb[22].mxu1 %vm250_vm4, %v1860_v5  ;;  %3331 = vmatpush3.bf16.msra.mxu0 %v3704_v6 }
0x1147   :  { %3332 = vmatprep.subr.bf16.mxu0 %v3587_v8  ;;  %3143 = vmatprep.mubr.msk.f32.mxu0 %vm3588_vm1, %v3589_v14 }
0x1148   :  { %3337 = vmatpush3.bf16.msra.mxu1 %v3775_v43  ;;  %3154 = vmatprep.mubr.msk.f32.mxu1 %vm3588_vm1, %v3589_v14 }
0x1149   :  { %3338 = vmatprep.subr.bf16.mxu1 %v3587_v8 }
0x114a   :  { %3334 = vmatpush3.bf16.msra.mxu0 %v3725_v13 }
0x114b   :  { %3341 = vmatprep.subr.bf16.mxu0 %v3587_v8 }
0x114c   :  { %3340 = vmatpush3.bf16.msra.mxu1 %v3798_v51 }
0x114d   :  { %3144 = vmatmul.mubr.msk.f32.vlgmr.msra.gmra.mrb[20].mxu0 %vm250_vm4, %v1860_v5  ;;  %3347 = vmatprep.subr.bf16.mxu1 %v3587_v8 }
0x114e   :  { %3343 = vmatpush3.bf16.msra.mxu0 %v3786_v47  ;;  %3165 = vmatprep.mubr.msk.f32.mxu0 %vm3588_vm1, %v3589_v14 }
0x114f   :  { %3344 = vmatprep.subr.bf16.mxu0 %v3587_v8 }
0x1152   :  { %3346 = vmatpush3.bf16.msra.mxu0 %v3806_v53 }
0x1153   :  { %3353 = vmatprep.subr.bf16.mxu0 %v3587_v8 }
0x1218   :  { %v1854_v38 = vpop.f32.mrb[18].mxu0 }
0x1219   :  { %v1929_v62 = vpop.f32.mrb[22].mxu1  ;;  %v3123_v7 = vpop.f32.mrb[19].mxu0 }
0x121a   :  { %v1930_v9 = vadd.f32 %v1929_v62, %v1854_v38  ;;  %v3134_v10 = vpop.f32.mrb[23].mxu1 }
0x121c   :  { %v1933_v11 = vadd.f32 %v3856_v1, %v1930_v9 }
0x121e   :  { %v2757_v12 = vmul.f32 -1.442695, %v1933_v11  ;;  %v3486_v11 = vld [vmem:[#allocation6] ss:$0 sm:$0xff] }
0x1220   :  { %3455 = vpow2.f32 %v2757_v12  ;;  %v2039_v23 = vpop.f32.mrb[20].mxu0  ;;  %v234_v12 = vadd.f32 %v3486_v11, %v3756_v22 }
0x1221   :  { %v2043_v20 = vadd.f32 %v2039_v23, %v229_v17  ;;  %v3145_v25 = vpop.f32.mrb[21].mxu0 }
0x1223   :  { %v2760_v26 = vmul.f32 -1.442695, %v2043_v20 }
0x1225   :  { %3457 = vpow2.f32 %v2760_v26 }
0x122a   :  { %v3456_v27 = vpop.eup %3455 }
0x122b   :  { %v1937_v59 = vadd.f32 1.0, %v3456_v27 }
0x122d   :  { %3459 = vrcp.f32 %v1937_v59 }
0x122f   :  { %v3458_v28 = vpop.eup %3457 }
0x1230   :  { %v2047_v29 = vadd.f32 1.0, %v3458_v28 }
0x1232   :  { %3461 = vrcp.f32 %v2047_v29 }
0x1237   :  { %v3460_v30 = vpop.eup %3459 }
0x1238   :  { %v1940_v19 = vmul.f32 2.0, %v3460_v30  ;;  %v1942_v35 = vmul.f32 %v3460_v30, %v4222_v49 }
0x123a   :  { %v2758_v18 = vadd.f32 -1.0, %v1940_v19 }
0x123c   :  { %v3462_v60 = vpop.eup %3461  ;;  %1944 = vrot.lane.b32.xlu1 %v2758_v18, %s3591_s30 }
0x123d   :  { %v2050_v31 = vmul.f32 2.0, %v3462_v60  ;;  %v2052_v61 = vmul.f32 %v3462_v60, %v4232_v55 }
0x123f   :  { %v2761_v21 = vadd.f32 -1.0, %v2050_v31 }
0x1241   :  { %2054 = vrot.lane.b32.xlu0 %v2761_v21, %s3591_s30 }
0x12ae   :  { %v1945_v24 = vpop.permute.xlu1 %1944 }
0x12af   :  { %v1947_v32 = vmul.f32 %v3460_v30, %v1945_v24 }
0x12b1   :  { %1949 = vrot.lane.b32.xlu1 %v1947_v32, %s3592_s11 }
0x12b3   :  { %v2055_v46 = vpop.permute.xlu0 %2054 }
0x12b4   :  { %v2057_v15 = vmul.f32 %v3462_v60, %v2055_v46 }
0x12b5   :  { %1970 = vperm.xlu1 %3387, %v1968_v34  }
0x12b6   :  { %2059 = vrot.lane.b32.xlu0 %v2057_v15, %s3592_s11 }
0x1323   :  { %v1950_v45 = vpop.permute.xlu1 %1949 }
0x1324   :  { %v4225_v40 = vadd.f32 %v1950_v45, %v1942_v35 }
0x1326   :  { %3463 = vtanh.f32 %v4225_v40  ;;  %v4291_v21 = vsel %vm1684_vm14, %v4225_v40, %v4222_v49 }
0x1328   :  { %v2060_v2 = vpop.permute.xlu0 %2059 }
0x1329   :  { %v4235_v57 = vadd.f32 %v2060_v2, %v2052_v61 }
0x132b   :  { %3465 = vtanh.f32 %v4235_v57 }
0x1330   :  { %v3464_v48 = vpop.eup %3463 }
0x1331   :  { %1955 = vrot.lane.b32.xlu0 %v3464_v48, %s3591_s30 }
0x1334   :  { %v4240_v5 = vpop.permute.xlu1 %1970 }
0x1335   :  { %v3466_v58 = vpop.eup %3465  ;;  %vm1972_vm0 = vcmp.eq.s32.totalorder %v4240_v5, 1 }
0x1336   :  { %2065 = vrot.lane.b32.xlu1 %v3466_v58, %s3591_s30  ;;  %v2069_v24 = vsel %vm1972_vm0, %v4235_v57, %v4232_v55 }
0x13a3   :  { %v1956_v4 = vpop.permute.xlu0 %1955 }
0x13a4   :  { %v4242_v38 = vmul.f32 %v3460_v30, %v1956_v4 }
0x13a6   :  { %v4248_v42 = vsel %vm1684_vm14, %v4242_v38, %v4172_v56 }
0x13a7   :  { %2072 = vrot.lane.b32.xlu0 %v4248_v42, %s3592_s11 }
0x13a8   :  { %v2066_v50 = vpop.permute.xlu1 %2065 }
0x13a9   :  { %v2068_v62 = vmul.f32 %v3462_v60, %v2066_v50  ;;  %v2540_v50 = vld [vmem:[#allocation2] sm:$0xff] }
0x13ab   :  { %v4256_v7 = vsel %vm1972_vm0, %v2068_v62, %v4179_v3 }
0x13ac   :  { %2147 = vrot.lane.b32.xlu1 %v4256_v7, %s3592_s11 }
0x1419   :  { %v2073_v9 = vpop.permute.xlu0 %2072 }
0x141a   :  { %3155 = vmatmul.mubr.msk.f32.vlgmr.msra.gmra.mrb[24].mxu1 %vm250_vm4, %v2073_v9 }
0x141b   :  { %3349 = vmatpush3.bf16.msra.mxu1 %v3704_v6  ;;  %3176 = vmatprep.mubr.msk.f32.mxu1 %vm3588_vm1, %v3589_v14 }
0x141c   :  { %3350 = vmatprep.subr.bf16.mxu1 %v3587_v8 }
0x141e   :  { %v2148_v56 = vpop.permute.xlu1 %2147 }
0x141f   :  { %3352 = vmatpush3.bf16.msra.mxu1 %v3725_v13  ;;  %3166 = vmatmul.mubr.msk.f32.vlgmr.msra.gmra.mrb[22].mxu0 %vm250_vm4, %v2148_v56 }
0x1420   :  { %3359 = vmatprep.subr.bf16.mxu1 %v3587_v8  ;;  %3355 = vmatpush3.bf16.msra.mxu0 %v3775_v43 }
0x1421   :  { %3356 = vmatprep.subr.bf16.mxu0 %v3587_v8  ;;  %3187 = vmatprep.mubr.msk.f32.mxu0 %vm3588_vm1, %v3589_v14 }
0x1422   :  { %3177 = vmatmul.mubr.msk.f32.vlgmr.msra.gmra.mrb[26].mxu1 %vm250_vm4, %v2148_v56 }
0x1423   :  { %3361 = vmatpush3.bf16.msra.mxu1 %v3786_v47  ;;  %3198 = vmatprep.mubr.msk.f32.mxu1 %vm3588_vm1, %v3589_v14  ;;  %vm2255_vm1 = vcmp.gt.s32.totalorder %v4212_v33, 7 }
0x1424   :  { %3362 = vmatprep.subr.bf16.mxu1 %v3587_v8  ;;  %3358 = vmatpush3.bf16.msra.mxu0 %v3798_v51  ;;  %v2256_v31 = vsel %vm2255_vm1, 1, %v3590_v16 }
0x1427   :  { %3364 = vmatpush3.bf16.msra.mxu1 %v3806_v53 }
0x14ed   :  { %v2142_v6 = vpop.f32.mrb[24].mxu1 }
0x14ee   :  { %v3156_v13 = vpop.f32.mrb[25].mxu1 }
0x14f2   :  { %v2217_v43 = vpop.f32.mrb[22].mxu0 }
0x14f3   :  { %v2218_v3 = vadd.f32 %v2217_v43, %v2142_v6  ;;  %v3167_v10 = vpop.f32.mrb[23].mxu0 }
0x14f5   :  { %v2221_v17 = vadd.f32 %v3856_v1, %v2218_v3  ;;  %v2327_v47 = vpop.f32.mrb[26].mxu1 }
0x14f6   :  { %v2331_v23 = vadd.f32 %v2327_v47, %v234_v12  ;;  %v3178_v20 = vpop.f32.mrb[27].mxu1  ;;  %v88_v47 = vld [vmem:[#allocation8] sm:$0xff] }
0x14f7   :  { %v2764_v14 = vmul.f32 -1.442695, %v2221_v17 }
0x14f8   :  { %v2767_v25 = vmul.f32 -1.442695, %v2331_v23  ;;  %v89_v23 = vld [vmem:[#allocation8 + $0x8] sm:$0xff] }
0x14f9   :  { %3467 = vpow2.f32 %v2764_v14  ;;  %v3365_v20 = vpack.c.bf16 %v89_v23, %v88_v47  ;;  %v90_v14 = vld [vmem:[#allocation8 + $0x10] sm:$0xff] }
0x14fa   :  { %3469 = vpow2.f32 %v2767_v25  ;;  %v91_v25 = vld [vmem:[#allocation8 + $0x18] sm:$0xff] }
0x14fb   :  { %3366 = vmatprep.subr.bf16.mxu0 %v3365_v20 }
0x1503   :  { %v3468_v8 = vpop.eup %3467 }
0x1504   :  { %v3470_v51 = vpop.eup %3469  ;;  %v2225_v53 = vadd.f32 1.0, %v3468_v8  ;;  %v3369_v8 = vpack.c.bf16 %v91_v25, %v90_v14 }
0x1505   :  { %v2335_v26 = vadd.f32 1.0, %v3470_v51 }
0x1506   :  { %3471 = vrcp.f32 %v2225_v53 }
0x1507   :  { %3473 = vrcp.f32 %v2335_v26  ;;  %v809_v26 = vsel %vm535_vm6, %v3947_v52, 0.0 }
0x1510   :  { %v3472_v27 = vpop.eup %3471 }
0x1511   :  { %v3474_v59 = vpop.eup %3473  ;;  %v2228_v28 = vmul.f32 2.0, %v3472_v27  ;;  %v2230_v32 = vmul.f32 %v3472_v27, %v4291_v21 }
0x1512   :  { %v2338_v29 = vmul.f32 2.0, %v3474_v59  ;;  %v2340_v33 = vmul.f32 %v3474_v59, %v2069_v24 }
0x1513   :  { %v2765_v22 = vadd.f32 -1.0, %v2228_v28 }
0x1514   :  { %v2768_v30 = vadd.f32 -1.0, %v2338_v29 }
0x1515   :  { %2232 = vrot.lane.b32.xlu0 %v2765_v22, %s3591_s30 }
0x1516   :  { %2342 = vrot.lane.b32.xlu1 %v2768_v30, %s3591_s30 }
0x1587   :  { %v2233_v1 = vpop.permute.xlu0 %2232 }
0x1588   :  { %v2343_v19 = vpop.permute.xlu1 %2342  ;;  %v2235_v18 = vmul.f32 %v3472_v27, %v2233_v1  ;;  %v1673_v1 = vsel %vm1396_vm12, %v4165_v37, 0.0 }
0x1589   :  { %v2345_v60 = vmul.f32 %v3474_v59, %v2343_v19 }
0x158a   :  { %2237 = vrot.lane.b32.xlu0 %v2235_v18, %s3592_s11 }
0x158b   :  { %2347 = vrot.lane.b32.xlu1 %v2345_v60, %s3592_s11 }
0x158e   :  { %2258 = vperm.xlu0 %3388, %v2256_v31  }
0x15fc   :  { %v2238_v34 = vpop.permute.xlu0 %2237 }
0x15fd   :  { %v2348_v46 = vpop.permute.xlu1 %2347  ;;  %v2240_v15 = vadd.f32 %v2238_v34, %v2230_v32 }
0x15fe   :  { %v2350_v35 = vadd.f32 %v2348_v46, %v2340_v33  ;;  %v2773_v33 = vld [vmem:[%s4394_s9] ss:$0 sm:$0xff]  ;;  %s3593_s9 = smov [#allocation9]  }
0x15ff   :  { %3475 = vtanh.f32 %v2240_v15  ;;  %v2247_v28 = vsel %vm1972_vm0, %v2240_v15, %v4291_v21 }
0x1600   :  { %3477 = vtanh.f32 %v2350_v35 }
0x1609   :  { %v3476_v16 = vpop.eup %3475 }
0x160a   :  { %v3478_v45 = vpop.eup %3477  ;;  %2243 = vrot.lane.b32.xlu1 %v3476_v16, %s3591_s30 }
0x160b   :  { %2353 = vrot.lane.b32.xlu0 %v3478_v45, %s3591_s30 }
0x160d   :  { %v4300_v49 = vpop.permute.xlu0 %2258 }
0x160e   :  { %vm2260_vm2 = vcmp.eq.s32.totalorder %v4300_v49, 1 }
0x167c   :  { %v2244_v40 = vpop.permute.xlu1 %2243 }
0x167d   :  { %v4302_v61 = vmul.f32 %v3472_v27, %v2244_v40  ;;  %v2354_v55 = vpop.permute.xlu0 %2353  ;;  %v1385_v27 = vsel %vm1108_vm10, %v4093_v0, 0.0 }
0x167e   :  { %v2356_v2 = vmul.f32 %v3474_v59, %v2354_v55  ;;  %v1961_v59 = vsel %vm1684_vm14, %v4242_v38, 0.0  ;;  %v1097_v38 = vsel %vm820_vm8, %v4021_v54, 0.0 }
0x167f   :  { %v2248_v57 = vsel %vm1972_vm0, %v4302_v61, %v4248_v42  ;;  %v2249_v19 = vsel %vm1972_vm0, %v4302_v61, 0.0 }
0x1680   :  { %2359 = vrot.lane.b32.xlu1 %v2248_v57, %s3592_s11  ;;  %v2357_v48 = vsel %vm2260_vm2, %v2356_v2, %v4256_v7  ;;  %v3487_v7 = vld [vmem:[%s4392_s7] ss:$0 sm:$0xff] }
0x1681   :  { %2434 = vrot.lane.b32.xlu0 %v2357_v48, %s3592_s11 }
0x16f2   :  { %v2360_v58 = vpop.permute.xlu1 %2359 }
0x16f3   :  { %v2435_v4 = vpop.permute.xlu0 %2434  ;;  %3188 = vmatmul.mubr.msk.f32.vlgmr.msra.gmra.mrb[24].mxu0 %vm250_vm4, %v2360_v58 }
0x16f4   :  { %3199 = vmatmul.mubr.msk.f32.vlgmr.msra.gmra.mrb[28].mxu1 %vm250_vm4, %v2435_v4  ;;  %3209 = vmatprep.mubr.msk.f32.mxu0 %vm250_vm4, %v2540_v50 }
0x16f5   :  { %3368 = vmatpush3.bf16.msra.mxu0 %v3365_v20 }
0x16f6   :  { %3370 = vmatprep.subr.bf16.mxu0 %v3369_v8 }
0x16f9   :  { %3372 = vmatpush3.bf16.msra.mxu0 %v3369_v8 }
0x17c6   :  { %v2429_v62 = vpop.f32.mrb[24].mxu0 }
0x17c7   :  { %v2504_v9 = vpop.f32.mrb[28].mxu1  ;;  %v3189_v42 = vpop.f32.mrb[25].mxu0 }
0x17c8   :  { %v2505_v56 = vadd.f32 %v2504_v9, %v2429_v62  ;;  %v3200_v6 = vpop.f32.mrb[29].mxu1 }
0x17ca   :  { %v2508_v13 = vadd.f32 %v3487_v7, %v2505_v56 }
0x17cc   :  { %v2771_v43 = vmul.f32 -1.442695, %v2508_v13 }
0x17ce   :  { %3479 = vpow2.f32 %v2771_v43 }
0x17d8   :  { %v3480_v3 = vpop.eup %3479 }
0x17d9   :  { %v2512_v10 = vadd.f32 1.0, %v3480_v3 }
0x17db   :  { %3481 = vrcp.f32 %v2512_v10 }
0x17e5   :  { %v3482_v11 = vpop.eup %3481 }
0x17e6   :  { %v2515_v12 = vmul.f32 2.0, %v3482_v11  ;;  %v2517_v39 = vmul.f32 %v3482_v11, %v2247_v28 }
0x17e8   :  { %v2772_v17 = vadd.f32 -1.0, %v2515_v12 }
0x17ea   :  { %2519 = vrot.lane.b32.xlu1 %v2772_v17, %s3591_s30 }
0x185c   :  { %v2520_v51 = vpop.permute.xlu1 %2519 }
0x185d   :  { %v2522_v53 = vmul.f32 %v3482_v11, %v2520_v51 }
0x185f   :  { %2524 = vrot.lane.b32.xlu0 %v2522_v53, %s3592_s11 }
0x1863   :  { %811 = vrot.lane.b32.xlu0 %v809_v26, %s3592_s11 }
0x1867   :  { %1387 = vrot.lane.b32.xlu0 %v1385_v27, %s3592_s11 }
0x186b   :  { %1963 = vrot.lane.b32.xlu0 %v1961_v59, %s3592_s11 }
0x18d1   :  { %v2525_v52 = vpop.permute.xlu0 %2524 }
0x18d2   :  { %v2527_v29 = vadd.f32 %v2525_v52, %v2517_v39 }
0x18d4   :  { %3483 = vtanh.f32 %v2527_v29 }
0x18d5   :  { %v812_v22 = vpop.permute.xlu0 %811 }
0x18d6   :  { %814 = vst.msk [vmem:[#allocation2 + $0x8] sm:$0xff] %vm250_vm4, %v812_v22 }
0x18d9   :  { %v1388_v44 = vpop.permute.xlu0 %1387 }
0x18da   :  { %1390 = vst.msk [vmem:[#allocation2 + $0x18] sm:$0xff] %vm250_vm4, %v1388_v44 }
0x18dd   :  { %v1964_v0 = vpop.permute.xlu0 %1963  ;;  %v2541_v30 = vld [vmem:[#allocation2 + $0x8] sm:$0xff] }
0x18de   :  { %v3484_v36 = vpop.eup %3483  ;;  %1966 = vst.msk [vmem:[#allocation2 + $0x28] sm:$0xff] %vm250_vm4, %v1964_v0  ;;  %3210 = vmatmul.mubr.msk.f32.vlgmr.msra.gmra.mrb[26].mxu0 %vm250_vm4, %v2541_v30 }
0x18df   :  { %2530 = vrot.lane.b32.xlu1 %v3484_v36, %s3591_s30 }
0x18e1   :  { %v2543_v5 = vld [vmem:[#allocation2 + $0x18] sm:$0xff] }
0x18e3   :  { %1099 = vrot.lane.b32.xlu1 %v1097_v38, %s3592_s11 }
0x18e5   :  { %v2545_v24 = vld [vmem:[#allocation2 + $0x28] sm:$0xff] }
0x18e7   :  { %1675 = vrot.lane.b32.xlu1 %v1673_v1, %s3592_s11 }
0x18eb   :  { %2251 = vrot.lane.b32.xlu1 %v2249_v19, %s3592_s11 }
0x1951   :  { %v2531_v18 = vpop.permute.xlu1 %2530 }
0x1952   :  { %v2533_v60 = vmul.f32 %v3482_v11, %v2531_v18 }
0x1954   :  { %v2534_v41 = vsel %vm2260_vm2, %v2533_v60, 0.0 }
0x1955   :  { %2536 = vrot.lane.b32.xlu0 %v2534_v41, %s3592_s11  ;;  %v1100_v54 = vpop.permute.xlu1 %1099  ;;  %s2696_s11 = sshll.u32 %s3593_s9, 4  ;;  %s2697_s11 = int_to_ptr.vmem [resolvable:$true] %s2696_s11 }
0x1956   :  { %1102 = vst.msk [vmem:[#allocation2 + $0x10] sm:$0xff] %vm250_vm4, %v1100_v54  ;;  %s3554_s15 = scalar_lea.vmem %s2697_s11, 1024  ;;  %p3559_p11 = scmp.lt.s32.totalorder %s2697_s11, %s2697_s11 }
0x1957   :  { %p3555_p10 = scmp.ne.s32.totalorder %s2697_s11, %s3554_s15  ;;  %p3560_p12 = scmp.lt.s32.totalorder %s3554_s15, %s3554_s15 }
0x1959   :  { %v1676_v63 = vpop.permute.xlu1 %1675  ;;  %p3561_p13 = por %p3560_p12, %p3559_p11 }
0x195a   :  { %1678 = vst.msk [vmem:[#allocation2 + $0x20] sm:$0xff] %vm250_vm4, %v1676_v63 }
0x195b   :  { %p3562_p0 = pnand %p3561_p13, %p3555_p10 }
0x195d   :  { %v2252_v37 = vpop.permute.xlu1 %2251  ;;  %v2542_v31 = vld [vmem:[#allocation2 + $0x10] sm:$0xff] }
0x195e   :  { %2254 = vst.msk [vmem:[#allocation2 + $0x30] sm:$0xff] %vm250_vm4, %v2252_v37  ;;  %3212 = vmatprep.mubr.msk.f32.mxu0 %vm250_vm4, %v2542_v31 }
0x195f   :  { %3213 = vmatmul.mubr.msk.f32.gmra.mrb[28].mxu0 %vm250_vm4, %v2543_v5 }
0x1961   :  { %v2544_v21 = vld [vmem:[#allocation2 + $0x20] sm:$0xff] }
0x1962   :  { %3215 = vmatprep.mubr.msk.f32.mxu0 %vm250_vm4, %v2544_v21 }
0x1963   :  { %3216 = vmatmul.mubr.msk.f32.gmra.mrb[30].mxu0 %vm250_vm4, %v2545_v24 }
0x1965   :  { %v2546_v32 = vld [vmem:[#allocation2 + $0x30] sm:$0xff] }
0x1966   :  { %3218 = vmatprep.mubr.msk.f32.mxu0 %vm250_vm4, %v2546_v32 }
0x19b1   :  { %v3211_v34 = vpop.f32.mrb[26].mxu0 }
0x19b2   :  { %v2650_v46 = vadd.f32 %v3211_v34, %v2773_v33  ;;  %v2644_v15 = vpop.f32.mrb[27].mxu0 }
0x19b3   :  { %v2645_v35 = vadd.f32 %v2773_v33, %v2644_v15 }
0x19b4   :  { %2684 = vst [vmem:[#allocation9 + $0x8] sm:$0xff] %v2650_v46 }
0x19b5   :  { %2683 = vst [vmem:[#allocation9] sm:$0xff] %v2645_v35 }
0x19c7   :  { %v2537_v16 = vpop.permute.xlu0 %2536 }
0x19c8   :  { %2539 = vst.msk [vmem:[#allocation2 + $0x38] sm:$0xff] %vm250_vm4, %v2537_v16 }
0x19cf   :  { %v2547_v45 = vld [vmem:[#allocation2 + $0x38] sm:$0xff] }
0x19d0   :  { %3219 = vmatmul.mubr.msk.f32.gmra.mrb[32].mxu0 %vm250_vm4, %v2547_v45 }
0x1a32   :  { %v3214_v49 = vpop.f32.mrb[28].mxu0 }
0x1a33   :  { %v2660_v40 = vadd.f32 %v3214_v49, %v2773_v33  ;;  %v2654_v61 = vpop.f32.mrb[29].mxu0 }
0x1a34   :  { %v2655_v55 = vadd.f32 %v2773_v33, %v2654_v61 }
0x1a35   :  { %2686 = vst [vmem:[#allocation9 + $0x18] sm:$0xff] %v2660_v40 }
0x1a36   :  { %2685 = vst [vmem:[#allocation9 + $0x10] sm:$0xff] %v2655_v55  ;;  %v3217_v2 = vpop.f32.mrb[30].mxu0 }
0x1a37   :  { %v2670_v57 = vadd.f32 %v3217_v2, %v2773_v33  ;;  %v2664_v48 = vpop.f32.mrb[31].mxu0 }
0x1a38   :  { %v2665_v58 = vadd.f32 %v2773_v33, %v2664_v48 }
0x1a39   :  { %2688 = vst [vmem:[#allocation9 + $0x28] sm:$0xff] %v2670_v57 }
0x1a3a   :  { %2687 = vst [vmem:[#allocation9 + $0x20] sm:$0xff] %v2665_v58 }
0x1aa3   :  { %v3220_v4 = vpop.f32.mrb[32].mxu0 }
0x1aa4   :  { %v2680_v50 = vadd.f32 %v3220_v4, %v2773_v33  ;;  %v2674_v62 = vpop.f32.mrb[33].mxu0 }
0x1aa5   :  { %v2675_v9 = vadd.f32 %v2773_v33, %v2674_v62 }
0x1aa6   :  { %2690 = vst [vmem:[#allocation9 + $0x38] sm:$0xff] %v2680_v50 }
0x1aa7   :  { %2689 = vst [vmem:[#allocation9 + $0x30] sm:$0xff] %v2675_v9 }
0x1aa8   :  { %3565 = shalt.err (!%p3562_p0)
}
0x1aa9   :  { %s3566_s3 = scalar_lea.hbm %s4395_s10, 1024 }
0x1aaa   :  { %p3567_p1 = scmp.ne.s32.totalorder %s4395_s10, %s3566_s3  ;;  %p3570_p2 = scmp.lt.u32.totalorder %s3566_s3, %s4395_s10 }
0x1aac   :  { %p3572_p3 = pnand %p3570_p2, %p3567_p1 }
0x1aae   :  { %3575 = shalt.err (!%p3572_p3)
}
0x1aaf   :  { %2702 = dma.vmem_to_hbm [thread:$0]  %s2697_s11, 1024, %s4395_s10, [#allocation5], %s3585_s2, %s3585_s2, %s3586_s16  }
0x1ab0   :  { %3580 = dma.done.wait [#allocation5], 1024  }
0x1ab1   :  { %3581 = vsyncadd [#allocation5], 4294966272 }
0x1ab2   :  { %2706 = vsyncpa [#allocation4], 1 }
0x1ab3   :  { %2707 = vsyncpa [#allocation7], 1 }
0x1ab4   :  { %2708 = vsyncpa [#allocation5], 1 }

</bundles_post_ra>
